<compile_context>
chip_gen: v7x
topology: tpu7x:2x2x1
jax: 0.10.0
libtpu: 0.0.40
codegen_flags: <defaults>
</compile_context>

<pallas_src>
import functools

import jax
import jax.numpy as jnp
from jax.experimental import pallas as pl
from jax.experimental.pallas import tpu as pltpu


def _round_up(a, b):
    return (a + b - 1) // b * b


def _legendre_link_kernel(xT_ref, wf_ref, bf_ref, a1t_ref, a1g_ref,
                          w0b_ref, wx1b_ref, cx_ref, sw0_ref, oT_ref):
    """Chain all flow blocks on one (D, bn) activation tile (batch on lanes).

    The per-block loop is a static Python unroll; the activation `z` never
    leaves the chip between blocks.  All refs except xT/oT are constants that
    Pallas keeps resident across grid steps (index_map always returns block 0).
    """
    nb = wf_ref.shape[0]
    H = a1t_ref.shape[1]

    z = xT_ref[...]                                                          # (D, bn) f32
    for b in range(nb):                                                      # static unroll
        # ---- ICNN forward: one fused matmul gives both x-projections; biases pre-broadcast ----
        fwd = jnp.dot(wf_ref[b], z, preferred_element_type=jnp.float32) + bf_ref[b]   # (2H, bn)
        pre1 = fwd[:H]
        # lean stable softplus: max(x, 0) + log(1 + exp(-|x|))
        u = jnp.exp(-jnp.abs(pre1))
        z1 = jnp.maximum(pre1, 0.0) + jnp.log(1.0 + u)
        # sigmoid(pre1) = exp(pre1 - softplus(pre1)): reuses z1, one extra EUP op
        sig1 = jnp.exp(pre1 - z1)
        pre2 = jnp.dot(a1t_ref[b], z1, preferred_element_type=jnp.float32) + fwd[H:]  # (H, bn)
        # sigmoid(pre2) via one exp + approx EUP reciprocal (cheap in the EUP slot)
        sig2 = pl.reciprocal(1.0 + jnp.exp(-pre2), approx=True)

        # ---- analytic d(icnn)/dx + DeepConvexFlow combine; g2 / softplus(w1) pre-folded ----
        gp1 = jnp.dot(a1g_ref[b], sig2, preferred_element_type=jnp.float32) * sig1    # (H, bn)
        z = (jnp.dot(w0b_ref[b], gp1, preferred_element_type=jnp.float32)             # sp(w1)*W0 @ gp1
             + jnp.dot(wx1b_ref[b], sig2, preferred_element_type=jnp.float32)         # sp(w1)*Wx1 @ gp2
             + cx_ref[b]                                                               # sp(w1)*Wx2
             + sw0_ref[0, b] * z)                                                      # sp(w0)*z

    oT_ref[...] = z.astype(oT_ref.dtype)


def _prepare_link_params(raw_blocks, bn):
    """Hoist ALL weight-only math out of the kernel; stack per flow block."""
    sp = jax.nn.softplus
    Wf, Bf, A1T, A1g, W0b, Wx1b, Cx, sw0 = [], [], [], [], [], [], [], []
    for (W0, b0, Wz1, Wx1, b1, Wz2, Wx2, w1, w0) in raw_blocks:
        D, H = W0.shape
        A1 = sp(Wz1) * (1.0 / H)                       # (H, H) positive PosLinear weights
        g2 = sp(Wz2) * (1.0 / H)                       # (1, H) positive last-layer weights
        sw1 = sp(w1[0, 0])
        Wf.append(jnp.concatenate([W0, Wx1], axis=1).T)                        # (2H, D)
        Bf.append(jnp.broadcast_to(jnp.concatenate([b0, b1], axis=1).T, (2 * H, bn)))
        A1T.append(A1.T)                                                       # forward PosLinear
        A1g.append(A1 * g2)                            # A1 @ diag(g2): folds gp2 = g2*sig2
        W0b.append(sw1 * W0)                                                   # (D, H)
        Wx1b.append(sw1 * (Wx1 * g2))                                          # (D, H)
        Cx.append(jnp.broadcast_to(sw1 * Wx2.T, (D, bn)))                      # (D, bn)
        sw0.append(sp(w0[0, 0]))
    f32 = jnp.float32
    return (jnp.stack(Wf).astype(f32), jnp.stack(Bf).astype(f32),
            jnp.stack(A1T).astype(f32), jnp.stack(A1g).astype(f32),
            jnp.stack(W0b).astype(f32), jnp.stack(Wx1b).astype(f32),
            jnp.stack(Cx).astype(f32),
            jnp.stack(sw0).reshape(1, -1).astype(f32))


def _vmem_limit_bytes(nb, D, H, bn):
    """Budget VMEM from actual block sizes (v7x only has 64 MiB per TensorCore)."""
    f = 4
    io = 2 * 2 * D * bn * f                                           # x^T/out tiles, double-buffered
    consts = 2 * nb * f * (2 * H * D + 2 * H * bn + 2 * H * H + 2 * D * H + D * bn)
    live = 8 * f * bn * (2 * H + 2 * H + D)                           # fwd / sig / gp temporaries
    return int(min(max(io + consts + live + (4 << 20), 8 << 20), 48 << 20))


def legendre_link_forward(x, raw_blocks, *, bn=256):
    """LegendreLink.forward: chain n_blocks DeepConvexFlow blocks in ONE pallas_call.

    bn tuning: on single-TC chips (v5e/v6e) prefer the largest bn dividing N;
    on v7x keep n_pad // bn a multiple of 2 so both TensorCores get work
    (bn=256 with N=512 -> grid=(2,), one step per core).
    """
    N, D = x.shape
    nb = len(raw_blocks)
    H = raw_blocks[0][2].shape[0]
    bn = max(128, min(_round_up(bn, 128), _round_up(N, 128)))        # lane-dense batch tile
    n_pad = _round_up(N, bn)

    Wf, Bf, A1T, A1g, W0b, Wx1b, Cx, sw0 = _prepare_link_params(raw_blocks, bn)

    # pad + transpose ONCE for the whole chain (batch lands on lanes).
    x_p = x if n_pad == N else jnp.pad(x, ((0, n_pad - N), (0, 0)))
    xT = x_p.T.astype(jnp.float32)                                    # (D, n_pad)

    const = lambda shape: pl.BlockSpec(shape, lambda i, _s=None, _n=len(shape): (0,) * _n)
    outT = pl.pallas_call(
        _legendre_link_kernel,
        out_shape=jax.ShapeDtypeStruct((D, n_pad), jnp.float32),
        grid=(n_pad // bn,),
        in_specs=[
            pl.BlockSpec((D, bn), lambda i: (0, i)),                  # x^T, tiled over batch (lanes)
            const((nb, 2 * H, D)),                                    # [W0 | Wx1]^T
            const((nb, 2 * H, bn)),                                   # [b0; b1] pre-broadcast
            const((nb, H, H)),                                        # A1^T          (forward)
            const((nb, H, H)),                                        # A1 * g2       (backward)
            const((nb, D, H)),                                        # softplus(w1) * W0
            const((nb, D, H)),                                        # softplus(w1) * Wx1 * g2
            const((nb, D, bn)),                                       # softplus(w1) * Wx2 pre-broadcast
            pl.BlockSpec(memory_space=pltpu.MemorySpace.SMEM),        # softplus(w0) per block
        ],
        out_specs=pl.BlockSpec((D, bn), lambda i: (0, i)),
        compiler_params=pltpu.CompilerParams(
            dimension_semantics=("parallel",),
            vmem_limit_bytes=_vmem_limit_bytes(nb, D, H, bn),
        ),
    )(xT, Wf, Bf, A1T, A1g, W0b, Wx1b, Cx, sw0)

    out = outT.T
    out = out[:N] if n_pad != N else out
    # TODO(synk): apply log_softmax_plus(out) here once its definition is available.
    return out.astype(x.dtype)


if __name__ == "__main__":
    key = jax.random.PRNGKey(0)
    n_blocks, N, D, H = 2, 512, 16, 32      # blocks, batch, K, dim_hidden
    bias_w1 = 0.0

    def uinit(k, shape, fan_in):
        b = 1.0 / jnp.sqrt(jnp.float32(fan_in))
        return jax.random.uniform(k, shape, jnp.float32, -b, b)

    keys = jax.random.split(key, 1 + n_blocks)
    x = jax.random.normal(keys[0], (N, D), jnp.float32)

    raw_blocks = []
    for b in range(n_blocks):
        ks = jax.random.split(keys[1 + b], 9)
        W0  = uinit(ks[0], (D, H), D)
        b0  = uinit(ks[1], (1, H), D)
        Wz1 = uinit(ks[2], (H, H), H)
        Wx1 = uinit(ks[3], (D, H), D)
        b1  = uinit(ks[4], (1, H), D)
        Wz2 = uinit(ks[5], (1, H), H)
        Wx2 = uinit(ks[6], (1, D), D)
        w1  = jax.random.normal(ks[7], (1, 1), jnp.float32) + bias_w1
        w0  = jax.random.normal(ks[8], (1, 1), jnp.float32)
        raw_blocks.append((W0, b0, Wz1, Wx1, b1, Wz2, Wx2, w1, w0))

    fwd = jax.jit(functools.partial(legendre_link_forward, bn=256))
    z = jax.block_until_ready(fwd(x, raw_blocks))

    # Pure-JAX reference: chained autodiff of the potential (mirrors torch.autograd.grad).
    def block_potential_sum(xx, p):
        W0, b0, Wz1, Wx1, b1, Wz2, Wx2, w1, w0 = p
        sp = jax.nn.softplus
        gain = 1.0 / Wz1.shape[0]
        z1 = sp(xx @ W0 + b0)
        z2 = sp(z1 @ (sp(Wz1) * gain) + xx @ Wx1 + b1)
        icnn = z2 @ (sp(Wz2) * gain).T + xx @ Wx2.T             # (N, 1)
        pot = sp(w1[0, 0]) * icnn + sp(w0[0, 0]) * (xx ** 2).sum(1, keepdims=True) / 2
        return pot.sum()

    z_ref = x
    for p in raw_blocks:
        z_ref = jax.grad(block_potential_sum)(z_ref, p)

    # 1e-3 tolerance: the approx-EUP reciprocal used for sigmoid(pre2) adds ~1e-4-level error.
    assert jnp.allclose(z, z_ref, atol=1e-3, rtol=1e-3), "mismatch vs autodiff reference"
    print("KERNEL_OK")
</pallas_src>

<mosaic_0001>
module attributes {stable_mosaic.version = 11 : i64} {
  func.func @_legendre_link_kernel(%arg0: i32, %arg1: memref<16x256xf32, #tpu.memory_space<vmem>>, %arg2: memref<2x64x16xf32, #tpu.memory_space<vmem>>, %arg3: memref<2x64x256xf32, #tpu.memory_space<vmem>>, %arg4: memref<2x32x32xf32, #tpu.memory_space<vmem>>, %arg5: memref<2x32x32xf32, #tpu.memory_space<vmem>>, %arg6: memref<2x16x32xf32, #tpu.memory_space<vmem>>, %arg7: memref<2x16x32xf32, #tpu.memory_space<vmem>>, %arg8: memref<2x16x256xf32, #tpu.memory_space<vmem>>, %arg9: memref<1x2xf32, #tpu.memory_space<smem>>, %arg10: memref<16x256xf32, #tpu.memory_space<vmem>>) attributes {dimension_semantics = [#tpu.dimension_semantics<parallel>], iteration_bounds = array<i64: 2>, scalar_prefetch = 0 : i64, scratch_operands = 0 : i64, tpu.core_type = #tpu.core_type<tc>, window_params = [{transform_indices = @transform_0, window_bounds = array<i64: 16, 256>}, {pipeline_mode = #tpu.pipeline_mode<synchronous>, transform_indices = @transform_1, window_bounds = array<i64: 2, 64, 16>}, {pipeline_mode = #tpu.pipeline_mode<synchronous>, transform_indices = @transform_2, window_bounds = array<i64: 2, 64, 256>}, {pipeline_mode = #tpu.pipeline_mode<synchronous>, transform_indices = @transform_3, window_bounds = array<i64: 2, 32, 32>}, {pipeline_mode = #tpu.pipeline_mode<synchronous>, transform_indices = @transform_4, window_bounds = array<i64: 2, 32, 32>}, {pipeline_mode = #tpu.pipeline_mode<synchronous>, transform_indices = @transform_5, window_bounds = array<i64: 2, 16, 32>}, {pipeline_mode = #tpu.pipeline_mode<synchronous>, transform_indices = @transform_6, window_bounds = array<i64: 2, 16, 32>}, {pipeline_mode = #tpu.pipeline_mode<synchronous>, transform_indices = @transform_7, window_bounds = array<i64: 2, 16, 256>}, {transform_indices = @transform_8, window_bounds = array<i64: 1, 2>}, {transform_indices = @transform_9, window_bounds = array<i64: 16, 256>}]} {
    %c0 = arith.constant 0 : index
    %c0_0 = arith.constant 0 : index
    %0 = vector.load %arg1[%c0, %c0_0] : memref<16x256xf32, #tpu.memory_space<vmem>>, vector<16x256xf32>
    %c0_1 = arith.constant 0 : index
    %c0_2 = arith.constant 0 : index
    %c0_3 = arith.constant 0 : index
    %1 = vector.load %arg2[%c0_1, %c0_2, %c0_3] : memref<2x64x16xf32, #tpu.memory_space<vmem>>, vector<1x64x16xf32>
    %2 = vector.shape_cast %1 : vector<1x64x16xf32> to vector<64x16xf32>
    %cst = arith.constant dense<0.000000e+00> : vector<64x256xf32>
    %3 = tpu.matmul %2, %0, %cst {dimension_numbers = #tpu.dot_dimension_numbers<[1], [0], [0], [1], [0, 0, 1, 1], [], []>} : vector<64x16xf32>, vector<16x256xf32>, vector<64x256xf32> -> vector<64x256xf32>
    %c0_4 = arith.constant 0 : index
    %c0_5 = arith.constant 0 : index
    %c0_6 = arith.constant 0 : index
    %4 = vector.load %arg3[%c0_4, %c0_5, %c0_6] : memref<2x64x256xf32, #tpu.memory_space<vmem>>, vector<1x64x256xf32>
    %5 = vector.shape_cast %4 : vector<1x64x256xf32> to vector<64x256xf32>
    %6 = arith.addf %3, %5 : vector<64x256xf32>
    %7 = vector.extract_strided_slice %6 {offsets = [0, 0], sizes = [32, 256], strides = [1, 1]} : vector<64x256xf32> to vector<32x256xf32>
    %8 = math.absf %7 : vector<32x256xf32>
    %cst_7 = arith.constant 0.000000e+00 : f32
    %9 = vector.broadcast %cst_7 : f32 to vector<32x256xf32>
    %10 = arith.subf %9, %8 : vector<32x256xf32>
    %11 = math.exp %10 : vector<32x256xf32>
    %cst_8 = arith.constant 0.000000e+00 : f32
    %12 = vector.broadcast %cst_8 : f32 to vector<32x256xf32>
    %13 = arith.maximumf %7, %12 : vector<32x256xf32>
    %cst_9 = arith.constant 1.000000e+00 : f32
    %14 = vector.broadcast %cst_9 : f32 to vector<32x256xf32>
    %15 = arith.addf %14, %11 : vector<32x256xf32>
    %16 = math.log %15 : vector<32x256xf32>
    %17 = arith.addf %13, %16 : vector<32x256xf32>
    %18 = arith.subf %7, %17 : vector<32x256xf32>
    %19 = math.exp %18 : vector<32x256xf32>
    %c0_10 = arith.constant 0 : index
    %c0_11 = arith.constant 0 : index
    %c0_12 = arith.constant 0 : index
    %20 = vector.load %arg4[%c0_10, %c0_11, %c0_12] : memref<2x32x32xf32, #tpu.memory_space<vmem>>, vector<1x32x32xf32>
    %21 = vector.shape_cast %20 : vector<1x32x32xf32> to vector<32x32xf32>
    %cst_13 = arith.constant dense<0.000000e+00> : vector<32x256xf32>
    %22 = tpu.matmul %21, %17, %cst_13 {dimension_numbers = #tpu.dot_dimension_numbers<[1], [0], [0], [1], [0, 0, 1, 1], [], []>} : vector<32x32xf32>, vector<32x256xf32>, vector<32x256xf32> -> vector<32x256xf32>
    %23 = vector.extract_strided_slice %6 {offsets = [32, 0], sizes = [32, 256], strides = [1, 1]} : vector<64x256xf32> to vector<32x256xf32>
    %24 = arith.addf %22, %23 : vector<32x256xf32>
    %cst_14 = arith.constant 0.000000e+00 : f32
    %25 = vector.broadcast %cst_14 : f32 to vector<32x256xf32>
    %26 = arith.subf %25, %24 : vector<32x256xf32>
    %27 = math.exp %26 : vector<32x256xf32>
    %cst_15 = arith.constant 1.000000e+00 : f32
    %28 = vector.broadcast %cst_15 : f32 to vector<32x256xf32>
    %29 = arith.addf %28, %27 : vector<32x256xf32>
    %30 = tpu.reciprocal %29 {approx = true} : vector<32x256xf32> -> vector<32x256xf32>
    %c0_16 = arith.constant 0 : index
    %c0_17 = arith.constant 0 : index
    %c0_18 = arith.constant 0 : index
    %31 = vector.load %arg5[%c0_16, %c0_17, %c0_18] : memref<2x32x32xf32, #tpu.memory_space<vmem>>, vector<1x32x32xf32>
    %32 = vector.shape_cast %31 : vector<1x32x32xf32> to vector<32x32xf32>
    %cst_19 = arith.constant dense<0.000000e+00> : vector<32x256xf32>
    %33 = tpu.matmul %32, %30, %cst_19 {dimension_numbers = #tpu.dot_dimension_numbers<[1], [0], [0], [1], [0, 0, 1, 1], [], []>} : vector<32x32xf32>, vector<32x256xf32>, vector<32x256xf32> -> vector<32x256xf32>
    %34 = arith.mulf %33, %19 : vector<32x256xf32>
    %c0_20 = arith.constant 0 : index
    %c0_21 = arith.constant 0 : index
    %c0_22 = arith.constant 0 : index
    %35 = vector.load %arg6[%c0_20, %c0_21, %c0_22] : memref<2x16x32xf32, #tpu.memory_space<vmem>>, vector<1x16x32xf32>
    %36 = vector.shape_cast %35 : vector<1x16x32xf32> to vector<16x32xf32>
    %cst_23 = arith.constant dense<0.000000e+00> : vector<16x256xf32>
    %37 = tpu.matmul %36, %34, %cst_23 {dimension_numbers = #tpu.dot_dimension_numbers<[1], [0], [0], [1], [0, 0, 1, 1], [], []>} : vector<16x32xf32>, vector<32x256xf32>, vector<16x256xf32> -> vector<16x256xf32>
    %c0_24 = arith.constant 0 : index
    %c0_25 = arith.constant 0 : index
    %c0_26 = arith.constant 0 : index
    %38 = vector.load %arg7[%c0_24, %c0_25, %c0_26] : memref<2x16x32xf32, #tpu.memory_space<vmem>>, vector<1x16x32xf32>
    %39 = vector.shape_cast %38 : vector<1x16x32xf32> to vector<16x32xf32>
    %cst_27 = arith.constant dense<0.000000e+00> : vector<16x256xf32>
    %40 = tpu.matmul %39, %30, %cst_27 {dimension_numbers = #tpu.dot_dimension_numbers<[1], [0], [0], [1], [0, 0, 1, 1], [], []>} : vector<16x32xf32>, vector<32x256xf32>, vector<16x256xf32> -> vector<16x256xf32>
    %41 = arith.addf %37, %40 : vector<16x256xf32>
    %c0_28 = arith.constant 0 : index
    %c0_29 = arith.constant 0 : index
    %c0_30 = arith.constant 0 : index
    %42 = vector.load %arg8[%c0_28, %c0_29, %c0_30] : memref<2x16x256xf32, #tpu.memory_space<vmem>>, vector<1x16x256xf32>
    %43 = vector.shape_cast %42 : vector<1x16x256xf32> to vector<16x256xf32>
    %44 = arith.addf %41, %43 : vector<16x256xf32>
    %c0_31 = arith.constant 0 : index
    %c0_32 = arith.constant 0 : index
    %45 = memref.load %arg9[%c0_31, %c0_32] : memref<1x2xf32, #tpu.memory_space<smem>>
    %46 = vector.broadcast %45 : f32 to vector<16x256xf32>
    %47 = arith.mulf %46, %0 : vector<16x256xf32>
    %48 = arith.addf %44, %47 : vector<16x256xf32>
    %c1 = arith.constant 1 : index
    %c0_33 = arith.constant 0 : index
    %c0_34 = arith.constant 0 : index
    %49 = vector.load %arg2[%c1, %c0_33, %c0_34] : memref<2x64x16xf32, #tpu.memory_space<vmem>>, vector<1x64x16xf32>
    %50 = vector.shape_cast %49 : vector<1x64x16xf32> to vector<64x16xf32>
    %cst_35 = arith.constant dense<0.000000e+00> : vector<64x256xf32>
    %51 = tpu.matmul %50, %48, %cst_35 {dimension_numbers = #tpu.dot_dimension_numbers<[1], [0], [0], [1], [0, 0, 1, 1], [], []>} : vector<64x16xf32>, vector<16x256xf32>, vector<64x256xf32> -> vector<64x256xf32>
    %c1_36 = arith.constant 1 : index
    %c0_37 = arith.constant 0 : index
    %c0_38 = arith.constant 0 : index
    %52 = vector.load %arg3[%c1_36, %c0_37, %c0_38] : memref<2x64x256xf32, #tpu.memory_space<vmem>>, vector<1x64x256xf32>
    %53 = vector.shape_cast %52 : vector<1x64x256xf32> to vector<64x256xf32>
    %54 = arith.addf %51, %53 : vector<64x256xf32>
    %55 = vector.extract_strided_slice %54 {offsets = [0, 0], sizes = [32, 256], strides = [1, 1]} : vector<64x256xf32> to vector<32x256xf32>
    %56 = math.absf %55 : vector<32x256xf32>
    %cst_39 = arith.constant 0.000000e+00 : f32
    %57 = vector.broadcast %cst_39 : f32 to vector<32x256xf32>
    %58 = arith.subf %57, %56 : vector<32x256xf32>
    %59 = math.exp %58 : vector<32x256xf32>
    %cst_40 = arith.constant 0.000000e+00 : f32
    %60 = vector.broadcast %cst_40 : f32 to vector<32x256xf32>
    %61 = arith.maximumf %55, %60 : vector<32x256xf32>
    %cst_41 = arith.constant 1.000000e+00 : f32
    %62 = vector.broadcast %cst_41 : f32 to vector<32x256xf32>
    %63 = arith.addf %62, %59 : vector<32x256xf32>
    %64 = math.log %63 : vector<32x256xf32>
    %65 = arith.addf %61, %64 : vector<32x256xf32>
    %66 = arith.subf %55, %65 : vector<32x256xf32>
    %67 = math.exp %66 : vector<32x256xf32>
    %c1_42 = arith.constant 1 : index
    %c0_43 = arith.constant 0 : index
    %c0_44 = arith.constant 0 : index
    %68 = vector.load %arg4[%c1_42, %c0_43, %c0_44] : memref<2x32x32xf32, #tpu.memory_space<vmem>>, vector<1x32x32xf32>
    %69 = vector.shape_cast %68 : vector<1x32x32xf32> to vector<32x32xf32>
    %cst_45 = arith.constant dense<0.000000e+00> : vector<32x256xf32>
    %70 = tpu.matmul %69, %65, %cst_45 {dimension_numbers = #tpu.dot_dimension_numbers<[1], [0], [0], [1], [0, 0, 1, 1], [], []>} : vector<32x32xf32>, vector<32x256xf32>, vector<32x256xf32> -> vector<32x256xf32>
    %71 = vector.extract_strided_slice %54 {offsets = [32, 0], sizes = [32, 256], strides = [1, 1]} : vector<64x256xf32> to vector<32x256xf32>
    %72 = arith.addf %70, %71 : vector<32x256xf32>
    %cst_46 = arith.constant 0.000000e+00 : f32
    %73 = vector.broadcast %cst_46 : f32 to vector<32x256xf32>
    %74 = arith.subf %73, %72 : vector<32x256xf32>
    %75 = math.exp %74 : vector<32x256xf32>
    %cst_47 = arith.constant 1.000000e+00 : f32
    %76 = vector.broadcast %cst_47 : f32 to vector<32x256xf32>
    %77 = arith.addf %76, %75 : vector<32x256xf32>
    %78 = tpu.reciprocal %77 {approx = true} : vector<32x256xf32> -> vector<32x256xf32>
    %c1_48 = arith.constant 1 : index
    %c0_49 = arith.constant 0 : index
    %c0_50 = arith.constant 0 : index
    %79 = vector.load %arg5[%c1_48, %c0_49, %c0_50] : memref<2x32x32xf32, #tpu.memory_space<vmem>>, vector<1x32x32xf32>
    %80 = vector.shape_cast %79 : vector<1x32x32xf32> to vector<32x32xf32>
    %cst_51 = arith.constant dense<0.000000e+00> : vector<32x256xf32>
    %81 = tpu.matmul %80, %78, %cst_51 {dimension_numbers = #tpu.dot_dimension_numbers<[1], [0], [0], [1], [0, 0, 1, 1], [], []>} : vector<32x32xf32>, vector<32x256xf32>, vector<32x256xf32> -> vector<32x256xf32>
    %82 = arith.mulf %81, %67 : vector<32x256xf32>
    %c1_52 = arith.constant 1 : index
    %c0_53 = arith.constant 0 : index
    %c0_54 = arith.constant 0 : index
    %83 = vector.load %arg6[%c1_52, %c0_53, %c0_54] : memref<2x16x32xf32, #tpu.memory_space<vmem>>, vector<1x16x32xf32>
    %84 = vector.shape_cast %83 : vector<1x16x32xf32> to vector<16x32xf32>
    %cst_55 = arith.constant dense<0.000000e+00> : vector<16x256xf32>
    %85 = tpu.matmul %84, %82, %cst_55 {dimension_numbers = #tpu.dot_dimension_numbers<[1], [0], [0], [1], [0, 0, 1, 1], [], []>} : vector<16x32xf32>, vector<32x256xf32>, vector<16x256xf32> -> vector<16x256xf32>
    %c1_56 = arith.constant 1 : index
    %c0_57 = arith.constant 0 : index
    %c0_58 = arith.constant 0 : index
    %86 = vector.load %arg7[%c1_56, %c0_57, %c0_58] : memref<2x16x32xf32, #tpu.memory_space<vmem>>, vector<1x16x32xf32>
    %87 = vector.shape_cast %86 : vector<1x16x32xf32> to vector<16x32xf32>
    %cst_59 = arith.constant dense<0.000000e+00> : vector<16x256xf32>
    %88 = tpu.matmul %87, %78, %cst_59 {dimension_numbers = #tpu.dot_dimension_numbers<[1], [0], [0], [1], [0, 0, 1, 1], [], []>} : vector<16x32xf32>, vector<32x256xf32>, vector<16x256xf32> -> vector<16x256xf32>
    %89 = arith.addf %85, %88 : vector<16x256xf32>
    %c1_60 = arith.constant 1 : index
    %c0_61 = arith.constant 0 : index
    %c0_62 = arith.constant 0 : index
    %90 = vector.load %arg8[%c1_60, %c0_61, %c0_62] : memref<2x16x256xf32, #tpu.memory_space<vmem>>, vector<1x16x256xf32>
    %91 = vector.shape_cast %90 : vector<1x16x256xf32> to vector<16x256xf32>
    %92 = arith.addf %89, %91 : vector<16x256xf32>
    %c0_63 = arith.constant 0 : index
    %c1_64 = arith.constant 1 : index
    %93 = memref.load %arg9[%c0_63, %c1_64] : memref<1x2xf32, #tpu.memory_space<smem>>
    %94 = vector.broadcast %93 : f32 to vector<16x256xf32>
    %95 = arith.mulf %94, %48 : vector<16x256xf32>
    %96 = arith.addf %92, %95 : vector<16x256xf32>
    %c0_65 = arith.constant 0 : index
    %c0_66 = arith.constant 0 : index
    %97 = vector.load %arg10[%c0_65, %c0_66] : memref<16x256xf32, #tpu.memory_space<vmem>>, vector<16x256xf32>
    tpu.vector_store %arg10[%c0_65, %c0_66], %96 {strides = array<i32>} : memref<16x256xf32, #tpu.memory_space<vmem>>, vector<16x256xf32>,
    return
  }
  func.func @transform_0(%arg0: i32) -> (i32, i32) {
    %c0_i32 = arith.constant 0 : i32
    %c0_i32_0 = arith.constant 0 : i32
    return %c0_i32, %arg0 : i32, i32
  }
  func.func @transform_1(%arg0: i32) -> (i32, i32, i32) {
    %c0_i32 = arith.constant 0 : i32
    %c0_i32_0 = arith.constant 0 : i32
    %c0_i32_1 = arith.constant 0 : i32
    %c0_i32_2 = arith.constant 0 : i32
    return %c0_i32, %c0_i32_0, %c0_i32_1 : i32, i32, i32
  }
  func.func @transform_2(%arg0: i32) -> (i32, i32, i32) {
    %c0_i32 = arith.constant 0 : i32
    %c0_i32_0 = arith.constant 0 : i32
    %c0_i32_1 = arith.constant 0 : i32
    %c0_i32_2 = arith.constant 0 : i32
    return %c0_i32, %c0_i32_0, %c0_i32_1 : i32, i32, i32
  }
  func.func @transform_3(%arg0: i32) -> (i32, i32, i32) {
    %c0_i32 = arith.constant 0 : i32
    %c0_i32_0 = arith.constant 0 : i32
    %c0_i32_1 = arith.constant 0 : i32
    %c0_i32_2 = arith.constant 0 : i32
    return %c0_i32, %c0_i32_0, %c0_i32_1 : i32, i32, i32
  }
  func.func @transform_4(%arg0: i32) -> (i32, i32, i32) {
    %c0_i32 = arith.constant 0 : i32
    %c0_i32_0 = arith.constant 0 : i32
    %c0_i32_1 = arith.constant 0 : i32
    %c0_i32_2 = arith.constant 0 : i32
    return %c0_i32, %c0_i32_0, %c0_i32_1 : i32, i32, i32
  }
  func.func @transform_5(%arg0: i32) -> (i32, i32, i32) {
    %c0_i32 = arith.constant 0 : i32
    %c0_i32_0 = arith.constant 0 : i32
    %c0_i32_1 = arith.constant 0 : i32
    %c0_i32_2 = arith.constant 0 : i32
    return %c0_i32, %c0_i32_0, %c0_i32_1 : i32, i32, i32
  }
  func.func @transform_6(%arg0: i32) -> (i32, i32, i32) {
    %c0_i32 = arith.constant 0 : i32
    %c0_i32_0 = arith.constant 0 : i32
    %c0_i32_1 = arith.constant 0 : i32
    %c0_i32_2 = arith.constant 0 : i32
    return %c0_i32, %c0_i32_0, %c0_i32_1 : i32, i32, i32
  }
  func.func @transform_7(%arg0: i32) -> (i32, i32, i32) {
    %c0_i32 = arith.constant 0 : i32
    %c0_i32_0 = arith.constant 0 : i32
    %c0_i32_1 = arith.constant 0 : i32
    %c0_i32_2 = arith.constant 0 : i32
    return %c0_i32, %c0_i32_0, %c0_i32_1 : i32, i32, i32
  }
  func.func @transform_8(%arg0: i32) -> (i32, i32) {
    %c0_i32 = arith.constant 0 : i32
    %c0_i32_0 = arith.constant 0 : i32
    %c0_i32_1 = arith.constant 0 : i32
    return %c0_i32, %c0_i32_0 : i32, i32
  }
  func.func @transform_9(%arg0: i32) -> (i32, i32) {
    %c0_i32 = arith.constant 0 : i32
    %c0_i32_0 = arith.constant 0 : i32
    return %c0_i32, %arg0 : i32, i32
  }
}

</mosaic_0001>

<bundles_post_ra>
// kernel: legendre_link_forward.1
= control target key start
LH: loop header
LB: loop body
LE: loop exit
PB: predicated region body
PF: predicated region fallthrough
CT: control target
= control target key end

     0   :  { %14 = vsyncpa [#allocation5], 0  ;;  %s3138_s0 = inlined_call_operand.vmem [shape: f32[16,512], index: 0, kind: input, shape index: {}]   ;;  %s3139_s1 = inlined_call_operand.vmem [shape: f32[2,64,16], index: 1, kind: input, shape index: {}]   ;;  %s3140_s2 = inlined_call_operand.vmem [shape: f32[2,64,256], index: 2, kind: input, shape index: {}]   ;;  %s3141_s3 = inlined_call_operand.vmem [shape: f32[2,32,32], index: 3, kind: input, shape index: {}]   ;;  %s3142_s4 = inlined_call_operand.vmem [shape: f32[2,32,32], index: 4, kind: input, shape index: {}]   ;;  %s3143_s5 = inlined_call_operand.vmem [shape: f32[2,16,32], index: 5, kind: input, shape index: {}]   ;;  %s3144_s6 = inlined_call_operand.vmem [shape: f32[2,16,32], index: 6, kind: input, shape index: {}]   ;;  %s3145_s7 = inlined_call_operand.vmem [shape: f32[2,16,256], index: 7, kind: input, shape index: {}]   ;;  %s3146_s8 = inlined_call_operand.vmem [shape: f32[1,2], index: 8, kind: input, shape index: {}]   ;;  %s3147_s9 = inlined_call_operand.hbm [shape: f32[16,512], index: 9, kind: output, shape index: {}]  }
   0x1   :  { %15 = vsyncpa [#allocation4], 0 }
   0x2   :  { %17 = vsyncpa [#allocation4 + $0x1], 0  ;;  %s2454_s30 = smov 0   ;;  %s2456_s10 = smov 0  }
   0x3   :  { %s2458_s11 = smov 0   ;;  %s2460_s12 = smov 0  }
   0x4 LB: > { %s2475_s13 = sadd.s32 4294967295, %s2396_s12   ;;  %s1890_s14 = sadd.s32 4294967294, %s2396_s12   ;;  %s2396_s12 = sphi %s2460_s12, %s3158_s12   ;;  %s2392_s11 = sphi %s2458_s11, %s3157_s11   ;;  %s2388_s10 = sphi %s2456_s10, %s3156_s10   ;;  %s2384_s30 = sphi %s2454_s30, %s3155_s30  }
   0x5   : > { %s2479_s15 = sadd.s32 1, %s2396_s12   ;;  %s30_s16 = sadd.s32 1, %s2392_s11 }
   0x6   : > { %s27_s17 = ssub.s32 %s2396_s12, %s2479_s15  ;;  %p37_p0 = scmp.ne.s32.totalorder %s2392_s11, %s2388_s10 }
   0x7   : > { %p28_p1 = scmp.eq.s32.totalorder %s27_s17, 0  ;;  %p38_p2 = scmp.eq.s32.totalorder %s2396_s12, 0 }
   0x8   : > { %p235_p3 = scmp.eq.s32.totalorder %s2475_s13, 1  ;;  %p240_p4 = scmp.ne.s32.totalorder %s2388_s10, %s2384_s30 }
   0x9   : > { %s2491_s18 = scalar_select %p28_p1, %s2392_s11, %s30_s16  }
   0xa   : > { %p2493_p5 = por %p38_p2, %p37_p0  ;;  %p2497_p6 = por %p235_p3, %p37_p0 }
   0xb   : > { %p241_p7 = scmp.eq.s32.totalorder %s1890_s14, 1  ;;  %p1891_p8 = scmp.ge.s32.totalorder %s2396_s12, 1 }
   0xc   : > { %s3150_s20 = scalar_select %p2497_p6, 1, 0 }
   0xd   : > { %p248_p9 = scmp.lt.s32.totalorder %s2396_s12, 3  ;;  %p2503_p10 = por %p241_p7, %p240_p4 }
   0xe   : > { %p2115_p11 = scmp.eq.s32.totalorder %s2475_s13, 0  ;;  %s282_s25 = sshll.u32 %s3146_s8, 4  ;;  %s283_s25 = int_to_ptr.vmem [resolvable:$true] %s282_s25 }
   0xf   : > { %s3151_s21 = scalar_select %p2503_p10, 1, 0 }
  0x10   : > { %p2508_p12 = pnand %p1891_p8, %p248_p9  ;;  %s2315_s26 = scalar_lea.vmem %s283_s25, 16 }
  0x11   : > { %p2316_p1 = scmp.ne.s32.totalorder %s283_s25, %s2315_s26  ;;  %p2323_p7 = scmp.lt.s32.totalorder %s283_s25, %s283_s25 }
  0x12   : > { %p2107_p13 = pneg %p2508_p12  ;;  %p2324_p8 = scmp.lt.s32.totalorder %s2315_s26, %s2315_s26 }
  0x14   : > { %p2108_p0 = pnand %p2115_p11, %p2107_p13  ;;  %p2325_p9 = por %p2324_p8, %p2323_p7 }
  0x16   : > { %p2317_p2 = pneg %p2108_p0 }
  0x18   : > { %p2318_p3 = pnand %p2317_p2, %p2316_p1 }
  0x1a   : > { %p2319_p4 = pneg %p2318_p3 }
  0x1c   : > { %p2326_p10 = pnand %p2325_p9, %p2319_p4 }
  0x1e   : > { %2329 = shalt.err (!%p2326_p10)
}
  0x1f   : > { %s2398_s27 = smov [#allocation3]   ;;  %p1893_p6 = scmp.ge.s32.totalorder %s2396_s12, 2 }
  0x20   : > { %2110 = dma.vmem_to_smem (!%p2108_p0), %s283_s25, 16, %s2398_s27, [#allocation5]  }
  0x21   : > { %289 = sbr.rel (%p1893_p6) target bundleno = 47 (0x2f), region = 48 }
  0x28   : > { %292 = sbr.rel (!%p2493_p5) target bundleno = 47 (0x2f), region = 52  ;;  %s294_s28 = sand.u32 (%p2493_p5), 1, %s2392_s11  }
  0x29   : > { %s1987_s29 = sshll.u32 (%p2493_p5), %s2396_s12, 4  ;;  %s1894_s14 = sshll.u32 (%p2493_p5), %s294_s28, 5 }
  0x2a   : > { %s299_s23 = scalar_lea.vmem (%p2493_p5), %s3138_s0, %s1987_s29  ;;  %s296_s24 = scalar_lea.vmem (%p2493_p5), [#allocation2], %s1894_s14 }
  0x2b   : > { %v312_v0 = vld [vmem:[%s299_s23] sm:$0xff] (%p2493_p5)  ;;  %v314_v1 = vld [vmem:[%s299_s23 + $0x8] sm:$0xff] (%p2493_p5) }
  0x2c   : > { %v316_v2 = vld [vmem:[%s299_s23 + $0x20] sm:$0xff] (%p2493_p5)  ;;  %313 = vst [vmem:[%s296_s24] sm:$0xff] (%p2493_p5), %v312_v0  ;;  %315 = vst [vmem:[%s296_s24 + $0x8] sm:$0xff] (%p2493_p5), %v314_v1  ;;  %v318_v3 = vld [vmem:[%s299_s23 + $0x28] sm:$0xff] (%p2493_p5) }
  0x2d   : > { %317 = vst [vmem:[%s296_s24 + $0x10] sm:$0xff] (%p2493_p5), %v316_v2  ;;  %319 = vst [vmem:[%s296_s24 + $0x18] sm:$0xff] (%p2493_p5), %v318_v3 }
  0x2f PF: > { %328 = sbr.rel (%p2508_p12) target bundleno = 2056 (0x808), region = 75  ;;  %s331_s19 = sand.u32 (!%p2508_p12), 1, %s2388_s10  }
  0x30   : > { %s2534_s25 = sshll.u32 (!%p2508_p12), %s331_s19, 5 }
  0x31   : > { %s333_s26 = scalar_lea.vmem (!%p2508_p12), [#allocation2], %s2534_s25 }
  0x36   : > { %2375 = dma.done.wait (%p2115_p11), [#allocation5], 16  }
  0x37   : > { %2377 = vsyncadd (%p2115_p11), [#allocation5], 4294967280 }
  0x38   : > { %341 = sfence }
  0x39   : > { %v2541_v4 = vld [vmem:[%s333_s26 + $0x8] sm:$0xff]  ;;  %v2543_v5 = vld [vmem:[%s333_s26 + $0x18] sm:$0xff]  ;;  %v2545_v6 = vld [vmem:[%s333_s26] sm:$0xff]  ;;  %v2399_v9 = vmov 0.0   ;;  %vm401_vm0 = vcmask 130048   ;;  %vm639_vm1 = vcmask 261120  }
  0x3a   : > { %v1989_v7 = vpack.c.bf16 %v2543_v5, %v2541_v4  ;;  %v2549_v8 = vld [vmem:[%s333_s26 + $0x10] sm:$0xff]  ;;  %490 = vmatprep.mubr.f32.mxu0 %v2399_v9  ;;  %861 = vmatprep.mubr.f32.mxu1 %v2399_v9  ;;  %v377_v11 = vld [vmem:[%s3139_s1] sm:$0xff]  ;;  %v378_v12 = vld [vmem:[%s3139_s1 + $0x8] sm:$0xff]  ;;  %s1072_s28 = sld [smem:[#allocation3]]  ;;  %s1981_s29 = sld [smem:[#allocation3 + $0x1]] }
  0x3b   : > { %v1991_v10 = vpack.c.bf16 %v2549_v8, %v2545_v6  ;;  %v379_v13 = vld [vmem:[%s3139_s1 + $0x10] sm:$0xff]  ;;  %v380_v14 = vld [vmem:[%s3139_s1 + $0x18] sm:$0xff]  ;;  %v381_v15 = vld [vmem:[%s3139_s1 + $0x20] sm:$0xff]  ;;  %s370_s22 = scalar_lea.vmem [#allocation6], %s2534_s25  ;;  %s1988_s14 = sshll.u32 %s2475_s13, 8 }
  0x3c   : > { %1990 = vmatprep.subr.bf16.mxu0 %v1989_v7  ;;  %v382_v16 = vld [vmem:[%s3139_s1 + $0x28] sm:$0xff]  ;;  %v383_v17 = vld [vmem:[%s3139_s1 + $0x30] sm:$0xff]  ;;  %v384_v18 = vld [vmem:[%s3139_s1 + $0x38] sm:$0xff]  ;;  %s1810_s27 = sshll.u32 %s370_s22, 4  ;;  %s3092_s13 = scalar_lea.hbm %s3147_s9, %s1988_s14  ;;  %s3086_s27 = int_to_ptr.vmem [resolvable:$true] %s1810_s27 }
  0x3d   : > { %1992 = vmatpush1.bf16.msra.mxu0 %v1991_v10  ;;  %v385_v19 = vld [vmem:[%s3140_s2] sm:$0xff]  ;;  %v386_v20 = vld [vmem:[%s3140_s2 + $0x8] sm:$0xff]  ;;  %v387_v25 = vld [vmem:[%s3140_s2 + $0x10] sm:$0xff]  ;;  %s3096_s17 = scalar_lea.sflag [#allocation4], %s331_s19  ;;  %s2330_s23 = scalar_lea.vmem %s3086_s27, 512 }
  0x3e   : > { %v388_v27 = vld [vmem:[%s3140_s2 + $0x18] sm:$0xff]  ;;  %v389_v35 = vld [vmem:[%s3140_s2 + $0x20] sm:$0xff]  ;;  %v390_v38 = vld [vmem:[%s3140_s2 + $0x28] sm:$0xff]  ;;  %p2331_p5 = scmp.ne.s32.totalorder %s3086_s27, %s2330_s23  ;;  %p3153_p10 = scmp.ne.s32.totalorder %s3150_s20, 0 }
  0x3f   : > { %v391_v47 = vld [vmem:[%s3140_s2 + $0x30] sm:$0xff]  ;;  %v392_v50 = vld [vmem:[%s3140_s2 + $0x38] sm:$0xff]  ;;  %s2400_s24 = smov [#allocation6]  }
  0x40   : > { %1901 = vmatmul.mubr.msk.f32.vlgmr.msra.gmra.mrb[0].mxu0 %vm401_vm0, %v377_v11  ;;  %p2332_p11 = pnand %p2331_p5, %p3153_p10  ;;  %s2334_s26 = sshll.u32 %s2400_s24, 4  ;;  %s2335_s26 = int_to_ptr.vmem [resolvable:$false] %s2334_s26 }
  0x41   : > { %496 = vmatprep.mubr.f32.mxu0 %v2399_v9  ;;  %p2337_p13 = scmp.lt.s32.totalorder %s3086_s27, %s2335_s26 }
  0x42   : > { %p2333_p12 = pneg %p2332_p11 }
  0x44   : > { %1902 = vmatmul.mubr.msk.f32.gmra.mrb[2].mxu0 %vm401_vm0, %v378_v12 }
  0x45   : > { %502 = vmatprep.mubr.f32.mxu0 %v2399_v9 }
  0x48   : > { %1903 = vmatmul.mubr.msk.f32.gmra.mrb[4].mxu0 %vm401_vm0, %v379_v13 }
  0x49   : > { %508 = vmatprep.mubr.f32.mxu0 %v2399_v9 }
  0x4c   : > { %1904 = vmatmul.mubr.msk.f32.gmra.mrb[6].mxu0 %vm401_vm0, %v380_v14 }
  0x4d   : > { %514 = vmatprep.mubr.f32.mxu0 %v2399_v9 }
  0x50   : > { %1905 = vmatmul.mubr.msk.f32.gmra.mrb[8].mxu0 %vm401_vm0, %v381_v15 }
  0x51   : > { %520 = vmatprep.mubr.f32.mxu0 %v2399_v9 }
  0x54   : > { %1906 = vmatmul.mubr.msk.f32.gmra.mrb[10].mxu0 %vm401_vm0, %v382_v16 }
  0x55   : > { %526 = vmatprep.mubr.f32.mxu0 %v2399_v9 }
  0x58   : > { %1907 = vmatmul.mubr.msk.f32.gmra.mrb[12].mxu0 %vm401_vm0, %v383_v17 }
  0x59   : > { %532 = vmatprep.mubr.f32.mxu0 %v2399_v9 }
  0x5c   : > { %1908 = vmatmul.mubr.msk.f32.gmra.mrb[14].mxu0 %vm401_vm0, %v384_v18 }
  0x5d   : > { %716 = vmatprep.mubr.f32.mxu0 %v2399_v9 }
 0x113   : > { %v492_v21 = vpop.f32.mrb[0].mxu0 }
 0x114   : > { %v2601_v22 = vadd.f32 %v492_v21, %v385_v19  ;;  %v494_v23 = vpop.f32.mrb[1].mxu0 }
 0x115   : > { %v2603_v24 = vadd.f32 %v494_v23, %v386_v20 }
 0x116   : > { %v539_v26 = vand.u32 2147483647, %v2601_v22 }
 0x117   : > { %v540_v28 = vand.u32 2147483647, %v2603_v24  ;;  %v498_v29 = vpop.f32.mrb[2].mxu0 }
 0x118   : > { %v547_v30 = vsub.f32 0.0, %v539_v26  ;;  %v2613_v31 = vadd.f32 %v498_v29, %v387_v25  ;;  %v500_v32 = vpop.f32.mrb[3].mxu0  ;;  %v571_v26 = vmax.f32 %v2601_v22, 0.0  ;;  %v572_v29 = vmax.f32 %v2603_v24, 0.0 }
 0x119   : > { %v548_v33 = vsub.f32 0.0, %v540_v28  ;;  %v2615_v34 = vadd.f32 %v500_v32, %v388_v27 }
 0x11a   : > { %v555_v36 = vmul.f32 1.442695, %v547_v30  ;;  %v541_v37 = vand.u32 2147483647, %v2613_v31 }
 0x11b   : > { %v557_v39 = vmul.f32 1.442695, %v548_v33  ;;  %v542_v40 = vand.u32 2147483647, %v2615_v34  ;;  %v504_v41 = vpop.f32.mrb[4].mxu0 }
 0x11c   : > { %2155 = vpow2.f32 %v555_v36  ;;  %v549_v42 = vsub.f32 0.0, %v541_v37  ;;  %v2625_v43 = vadd.f32 %v504_v41, %v389_v35  ;;  %v506_v44 = vpop.f32.mrb[5].mxu0 }
 0x11d   : > { %2157 = vpow2.f32 %v557_v39  ;;  %v550_v45 = vsub.f32 0.0, %v542_v40  ;;  %v2627_v46 = vadd.f32 %v506_v44, %v390_v38  ;;  %v573_v39 = vmax.f32 %v2613_v31, 0.0 }
 0x11e   : > { %v559_v48 = vmul.f32 1.442695, %v549_v42  ;;  %v543_v49 = vand.u32 2147483647, %v2625_v43  ;;  %v574_v42 = vmax.f32 %v2615_v34, 0.0 }
 0x11f   : > { %v561_v51 = vmul.f32 1.442695, %v550_v45  ;;  %v544_v52 = vand.u32 2147483647, %v2627_v46  ;;  %v510_v53 = vpop.f32.mrb[6].mxu0 }
 0x120   : > { %2159 = vpow2.f32 %v559_v48  ;;  %v551_v54 = vsub.f32 0.0, %v543_v49  ;;  %v2637_v55 = vadd.f32 %v510_v53, %v391_v47  ;;  %v512_v56 = vpop.f32.mrb[7].mxu0 }
 0x121   : > { %2161 = vpow2.f32 %v561_v51  ;;  %v552_v57 = vsub.f32 0.0, %v544_v52  ;;  %v2639_v58 = vadd.f32 %v512_v56, %v392_v50  ;;  %v575_v51 = vmax.f32 %v2625_v43, 0.0 }
 0x122   : > { %v563_v59 = vmul.f32 1.442695, %v551_v54  ;;  %v545_v60 = vand.u32 2147483647, %v2637_v55  ;;  %v576_v56 = vmax.f32 %v2627_v46, 0.0 }
 0x123   : > { %v565_v61 = vmul.f32 1.442695, %v552_v57  ;;  %v546_v62 = vand.u32 2147483647, %v2639_v58 }
 0x124   : > { %2163 = vpow2.f32 %v563_v59  ;;  %v553_v63 = vsub.f32 0.0, %v545_v60 }
 0x125   : > { %2165 = vpow2.f32 %v565_v61  ;;  %v554_v0 = vsub.f32 0.0, %v546_v62 }
 0x126   : > { %v2156_v1 = vpop.eup %2155  ;;  %v567_v2 = vmul.f32 1.442695, %v553_v63 }
 0x127   : > { %v2158_v3 = vpop.eup %2157  ;;  %v579_v7 = vadd.f32 1.0, %v2156_v1  ;;  %v569_v10 = vmul.f32 1.442695, %v554_v0  ;;  %v577_v0 = vmax.f32 %v2637_v55, 0.0 }
 0x128   : > { %v580_v11 = vadd.f32 1.0, %v2158_v3  ;;  %2167 = vpow2.f32 %v567_v2 }
 0x129   : > { %2169 = vlog2.f32 %v579_v7 }
 0x12a   : > { %v2160_v12 = vpop.eup %2159  ;;  %2171 = vlog2.f32 %v580_v11 }
 0x12b   : > { %v2162_v13 = vpop.eup %2161  ;;  %v581_v14 = vadd.f32 1.0, %v2160_v12  ;;  %2173 = vpow2.f32 %v569_v10  ;;  %v578_v10 = vmax.f32 %v2639_v58, 0.0 }
 0x12c   : > { %v582_v15 = vadd.f32 1.0, %v2162_v13 }
 0x12d   : > { %2175 = vlog2.f32 %v581_v14 }
 0x12e   : > { %v2164_v16 = vpop.eup %2163  ;;  %2177 = vlog2.f32 %v582_v15 }
 0x12f   : > { %v2166_v17 = vpop.eup %2165  ;;  %v583_v18 = vadd.f32 1.0, %v2164_v16 }
 0x130   : > { %v584_v19 = vadd.f32 1.0, %v2166_v17  ;;  %v635_v17 = vld [vmem:[%s3141_s3] sm:$0xff] }
 0x131   : > { %2179 = vlog2.f32 %v583_v18  ;;  %v636_v18 = vld [vmem:[%s3141_s3 + $0x8] sm:$0xff] }
 0x132   : > { %v2168_v20 = vpop.eup %2167  ;;  %2181 = vlog2.f32 %v584_v19  ;;  %v637_v19 = vld [vmem:[%s3141_s3 + $0x10] sm:$0xff] }
 0x133   : > { %v2170_v21 = vpop.eup %2169  ;;  %v585_v23 = vadd.f32 1.0, %v2168_v20  ;;  %v638_v20 = vld [vmem:[%s3141_s3 + $0x18] sm:$0xff] }
 0x134   : > { %v2172_v25 = vpop.eup %2171  ;;  %v588_v27 = vmul.f32 0.6931472, %v2170_v21  ;;  %v393_v21 = vld [vmem:[%s3140_s2 + $0x40] sm:$0xff] }
 0x135   : > { %v2174_v28 = vpop.eup %2173  ;;  %v590_v30 = vmul.f32 0.6931472, %v2172_v25  ;;  %2183 = vlog2.f32 %v585_v23  ;;  %v394_v23 = vld [vmem:[%s3140_s2 + $0x48] sm:$0xff] }
 0x136   : > { %v2645_v32 = vadd.f32 %v588_v27, %v571_v26  ;;  %v586_v33 = vadd.f32 1.0, %v2174_v28 }
 0x137   : > { %v2176_v35 = vpop.eup %2175  ;;  %v2647_v36 = vadd.f32 %v590_v30, %v572_v29  ;;  %v395_v29 = vld [vmem:[%s3140_s2 + $0x50] sm:$0xff] }
 0x138   : > { %v2178_v37 = vpop.eup %2177  ;;  %v611_v38 = vsub.f32 %v2601_v22, %v2645_v32  ;;  %v592_v40 = vmul.f32 0.6931472, %v2176_v35  ;;  %2185 = vlog2.f32 %v586_v33  ;;  %v396_v33 = vld [vmem:[%s3140_s2 + $0x58] sm:$0xff] }
 0x139   : > { %v612_v41 = vsub.f32 %v2603_v24, %v2647_v36  ;;  %v594_v44 = vmul.f32 0.6931472, %v2178_v37 }
 0x13a   : > { %v2655_v45 = vadd.f32 %v592_v40, %v573_v39 }
 0x13b   : > { %v2180_v47 = vpop.eup %2179  ;;  %v2657_v48 = vadd.f32 %v594_v44, %v574_v42 }
 0x13c   : > { %v2182_v49 = vpop.eup %2181  ;;  %v613_v50 = vsub.f32 %v2613_v31, %v2655_v45  ;;  %v596_v52 = vmul.f32 0.6931472, %v2180_v47  ;;  %v1995_v53 = vpack.c.bf16 %v2655_v45, %v2645_v32 }
 0x13d   : > { %v614_v54 = vsub.f32 %v2615_v34, %v2657_v48  ;;  %v598_v57 = vmul.f32 0.6931472, %v2182_v49  ;;  %v1993_v59 = vpack.c.bf16 %v2657_v48, %v2647_v36  ;;  %v397_v49 = vld [vmem:[%s3140_s2 + $0x60] sm:$0xff] }
 0x13e   : > { %v2669_v60 = vadd.f32 %v596_v52, %v575_v51  ;;  %v398_v52 = vld [vmem:[%s3140_s2 + $0x68] sm:$0xff] }
 0x13f   : > { %v2184_v61 = vpop.eup %2183  ;;  %v2671_v62 = vadd.f32 %v598_v57, %v576_v56  ;;  %1994 = vmatprep.subr.bf16.mxu0 %v1993_v59 }
 0x140   : > { %v615_v63 = vsub.f32 %v2625_v43, %v2669_v60  ;;  %v600_v1 = vmul.f32 0.6931472, %v2184_v61  ;;  %1996 = vmatpush1.bf16.msra.mxu0 %v1995_v53 }
 0x141   : > { %v616_v2 = vsub.f32 %v2627_v46, %v2671_v62 }
 0x142   : > { %v2186_v3 = vpop.eup %2185  ;;  %v2678_v7 = vadd.f32 %v600_v1, %v577_v0  ;;  %v627_v22 = vmul.f32 1.442695, %v615_v63 }
 0x143   : > { %v602_v11 = vmul.f32 0.6931472, %v2186_v3  ;;  %v399_v3 = vld [vmem:[%s3140_s2 + $0x70] sm:$0xff]  ;;  %v629_v24 = vmul.f32 1.442695, %v616_v2 }
 0x144   : > { %v617_v12 = vsub.f32 %v2637_v55, %v2678_v7  ;;  %v1999_v13 = vpack.c.bf16 %v2678_v7, %v2669_v60 }
 0x145   : > { %v2685_v14 = vadd.f32 %v602_v11, %v578_v10  ;;  %v400_v11 = vld [vmem:[%s3140_s2 + $0x78] sm:$0xff] }
 0x146   : > { %v631_v31 = vmul.f32 1.442695, %v617_v12 }
 0x147   : > { %v618_v15 = vsub.f32 %v2639_v58, %v2685_v14  ;;  %v1997_v16 = vpack.c.bf16 %v2685_v14, %v2671_v62 }
 0x149   : > { %1998 = vmatprep.subr.bf16.mxu0 %v1997_v16  ;;  %v633_v34 = vmul.f32 1.442695, %v618_v15 }
 0x14a   : > { %2000 = vmatpush1.bf16.msra.mxu0 %v1999_v13 }
 0x14d   : > { %1909 = vmatmul.mubr.msk.f32.vlgmr.msra.gmra.mrb[8].mxu0 %vm639_vm1, %v635_v17 }
 0x14e   : > { %722 = vmatprep.mubr.f32.mxu0 %v2399_v9 }
 0x151   : > { %1910 = vmatmul.mubr.msk.f32.gmra.mrb[10].mxu0 %vm639_vm1, %v636_v18 }
 0x152   : > { %728 = vmatprep.mubr.f32.mxu0 %v2399_v9 }
 0x155   : > { %1911 = vmatmul.mubr.msk.f32.gmra.mrb[12].mxu0 %vm639_vm1, %v637_v19 }
 0x156   : > { %734 = vmatprep.mubr.f32.mxu0 %v2399_v9 }
 0x159   : > { %1912 = vmatmul.mubr.msk.f32.gmra.mrb[14].mxu0 %vm639_vm1, %v638_v20 }
 0x15a   : > { %1568 = vmatprep.mubr.f32.mxu0 %v2399_v9 }
 0x220   : > { %v718_v25 = vpop.f32.mrb[8].mxu0 }
 0x221   : > { %v2061_v26 = vadd.f32 %v718_v25, %v393_v21  ;;  %v720_v27 = vpop.f32.mrb[9].mxu0 }
 0x222   : > { %v2062_v28 = vadd.f32 %v720_v27, %v394_v23 }
 0x223   : > { %v741_v30 = vsub.f32 0.0, %v2061_v26 }
 0x224   : > { %v742_v35 = vsub.f32 0.0, %v2062_v28  ;;  %v724_v37 = vpop.f32.mrb[10].mxu0 }
 0x225   : > { %v749_v39 = vmul.f32 1.442695, %v741_v30  ;;  %v2063_v40 = vadd.f32 %v724_v37, %v395_v29  ;;  %v726_v42 = vpop.f32.mrb[11].mxu0 }
 0x226   : > { %v751_v44 = vmul.f32 1.442695, %v742_v35  ;;  %v2064_v47 = vadd.f32 %v726_v42, %v396_v33 }
 0x227   : > { %2187 = vpow2.f32 %v749_v39  ;;  %v743_v51 = vsub.f32 0.0, %v2063_v40 }
 0x228   : > { %2189 = vpow2.f32 %v751_v44  ;;  %v744_v53 = vsub.f32 0.0, %v2064_v47  ;;  %v730_v56 = vpop.f32.mrb[12].mxu0 }
 0x229   : > { %v753_v57 = vmul.f32 1.442695, %v743_v51  ;;  %v2065_v59 = vadd.f32 %v730_v56, %v397_v49  ;;  %v732_v61 = vpop.f32.mrb[13].mxu0 }
 0x22a   : > { %v755_v0 = vmul.f32 1.442695, %v744_v53  ;;  %v2066_v1 = vadd.f32 %v732_v61, %v398_v52 }
 0x22b   : > { %2191 = vpow2.f32 %v753_v57  ;;  %v745_v10 = vsub.f32 0.0, %v2065_v59 }
 0x22c   : > { %2193 = vpow2.f32 %v755_v0  ;;  %v746_v13 = vsub.f32 0.0, %v2066_v1  ;;  %v736_v16 = vpop.f32.mrb[14].mxu0 }
 0x22d   : > { %v757_v17 = vmul.f32 1.442695, %v745_v10  ;;  %v2067_v18 = vadd.f32 %v736_v16, %v399_v3  ;;  %v738_v19 = vpop.f32.mrb[15].mxu0 }
 0x22e   : > { %v759_v20 = vmul.f32 1.442695, %v746_v13  ;;  %v2068_v21 = vadd.f32 %v738_v19, %v400_v11  ;;  %v781_v19 = vld [vmem:[%s3142_s4] sm:$0xff] }
 0x22f   : > { %2195 = vpow2.f32 %v757_v17  ;;  %v747_v23 = vsub.f32 0.0, %v2067_v18 }
 0x230   : > { %v748_v25 = vsub.f32 0.0, %v2068_v21  ;;  %2197 = vpow2.f32 %v759_v20  ;;  %v782_v20 = vld [vmem:[%s3142_s4 + $0x8] sm:$0xff]  ;;  %v783_v21 = vld [vmem:[%s3142_s4 + $0x10] sm:$0xff] }
 0x231   : > { %v2188_v26 = vpop.eup %2187  ;;  %v761_v27 = vmul.f32 1.442695, %v747_v23  ;;  %v784_v23 = vld [vmem:[%s3142_s4 + $0x18] sm:$0xff] }
 0x232   : > { %v2190_v28 = vpop.eup %2189  ;;  %v765_v29 = vadd.f32 1.0, %v2188_v26  ;;  %v763_v30 = vmul.f32 1.442695, %v748_v25  ;;  %v896_v25 = vld [vmem:[%s3144_s6] sm:$0xff]  ;;  %v897_v26 = vld [vmem:[%s3144_s6 + $0x8] sm:$0xff] }
 0x233   : > { %v766_v33 = vadd.f32 1.0, %v2190_v28  ;;  %2199 = vpow2.f32 %v761_v27  ;;  %v619_v27 = vmul.f32 1.442695, %v611_v38  ;;  %v621_v28 = vmul.f32 1.442695, %v612_v41 }
 0x234   : > { %2201 = vrcp.f32 %v765_v29  ;;  %v623_v29 = vmul.f32 1.442695, %v613_v50 }
 0x235   : > { %v2192_v35 = vpop.eup %2191  ;;  %2203 = vpow2.f32 %v763_v30  ;;  %v625_v30 = vmul.f32 1.442695, %v614_v54 }
 0x236   : > { %v2194_v37 = vpop.eup %2193  ;;  %v767_v39 = vadd.f32 1.0, %v2192_v35  ;;  %2205 = vrcp.f32 %v766_v33 }
 0x237   : > { %v768_v40 = vadd.f32 1.0, %v2194_v37 }
 0x238   : > { %2207 = vrcp.f32 %v767_v39 }
 0x239   : > { %v2196_v42 = vpop.eup %2195  ;;  %2209 = vrcp.f32 %v768_v40 }
 0x23a   : > { %v2198_v44 = vpop.eup %2197  ;;  %v769_v47 = vadd.f32 1.0, %v2196_v42 }
 0x23b   : > { %v770_v51 = vadd.f32 1.0, %v2198_v44 }
 0x23c   : > { %2211 = vrcp.f32 %v769_v47 }
 0x23d   : > { %v2200_v49 = vpop.eup %2199 }
 0x23e   : > { %v771_v52 = vadd.f32 1.0, %v2200_v49  ;;  %v2202_v53 = vpop.eup %2201  ;;  %v894_v49 = vld [vmem:[%s3143_s5] sm:$0xff] }
 0x23f   : > { %v2204_v56 = vpop.eup %2203 }
 0x240   : > { %2213 = vrcp.f32 %v771_v52  ;;  %v2206_v57 = vpop.eup %2205  ;;  %v772_v59 = vadd.f32 1.0, %v2204_v56  ;;  %v1073_v52 = vstv %s1072_s28  ;;  %s2336_s28 = scalar_lea.vmem %s2335_s26, 1024 }
 0x241   : > { %2215 = vrcp.f32 %v770_v51  ;;  %v895_v51 = vld [vmem:[%s3143_s5 + $0x8] sm:$0xff]  ;;  %v1074_v56 = vmul.f32 %v1073_v52, %v2545_v6  ;;  %v1067_v6 = vld [vmem:[%s3145_s7 + $0x18] sm:$0xff]  ;;  %p2338_p0 = scmp.lt.s32.totalorder %s2336_s28, %s2330_s23 }
 0x242   : > { %v2208_v61 = vpop.eup %2207  ;;  %2217 = vrcp.f32 %v772_v59  ;;  %v1075_v59 = vmul.f32 %v1073_v52, %v2541_v4 }
 0x243   : > { %v2210_v0 = vpop.eup %2209  ;;  %v2003_v1 = vpack.c.bf16 %v2208_v61, %v2202_v53  ;;  %2219 = vpow2.f32 %v619_v27  ;;  %v1064_v53 = vld [vmem:[%s3145_s7] sm:$0xff]  ;;  %v1923_v27 = vld [vmem:[%s3139_s1 + $0x50] sm:$0xff]  ;;  %p2339_p1 = por %p2338_p0, %p2337_p13 }
 0x244   : > { %v2001_v3 = vpack.c.bf16 %v2210_v0, %v2206_v57  ;;  %2221 = vpow2.f32 %v621_v28  ;;  %v1065_v57 = vld [vmem:[%s3145_s7 + $0x8] sm:$0xff]  ;;  %v1924_v28 = vld [vmem:[%s3139_s1 + $0x58] sm:$0xff] }
 0x245   : > { %2223 = vpow2.f32 %v623_v29  ;;  %v1925_v29 = vld [vmem:[%s3139_s1 + $0x60] sm:$0xff]  ;;  %p2340_p2 = pnand %p2339_p1, %p2333_p12 }
 0x246   : > { %2002 = vmatprep.subr.bf16.mxu1 %v2001_v3  ;;  %v2212_v10 = vpop.eup %2211  ;;  %2225 = vpow2.f32 %v625_v30  ;;  %v1926_v30 = vld [vmem:[%s3139_s1 + $0x68] sm:$0xff] }
 0x247   : > { %2004 = vmatpush1.bf16.msra.mxu1 %v2003_v1  ;;  %2227 = vpow2.f32 %v627_v22  ;;  %v1927_v22 = vld [vmem:[%s3139_s1 + $0x70] sm:$0xff] }
 0x248   : > { %2229 = vpow2.f32 %v629_v24  ;;  %v1928_v24 = vld [vmem:[%s3139_s1 + $0x78] sm:$0xff] }
 0x249   : > { %2231 = vpow2.f32 %v631_v31  ;;  %v1929_v31 = vld [vmem:[%s3140_s2 + $0x80] sm:$0xff] }
 0x24a   : > { %v2214_v11 = vpop.eup %2213  ;;  %2233 = vpow2.f32 %v633_v34  ;;  %v1930_v34 = vld [vmem:[%s3140_s2 + $0x88] sm:$0xff] }
 0x24b   : > { %v2007_v13 = vpack.c.bf16 %v2214_v11, %v2212_v10  ;;  %v2216_v16 = vpop.eup %2215  ;;  %v1066_v10 = vld [vmem:[%s3145_s7 + $0x10] sm:$0xff]  ;;  %v1076_v11 = vmul.f32 %v1073_v52, %v2549_v8 }
 0x24c   : > { %v2218_v17 = vpop.eup %2217 }
 0x24d   : > { %v2005_v18 = vpack.c.bf16 %v2218_v17, %v2216_v16  ;;  %v2220_v32 = vpop.eup %2219  ;;  %v1077_v16 = vmul.f32 %v1073_v52, %v2543_v5  ;;  %v1921_v5 = vld [vmem:[%s3139_s1 + $0x40] sm:$0xff] }
 0x24e   : > { %v2222_v38 = vpop.eup %2221 }
 0x24f   : > { %2006 = vmatprep.subr.bf16.mxu1 %v2005_v18  ;;  %v2224_v46 = vpop.eup %2223 }
 0x250   : > { %2008 = vmatpush1.bf16.msra.mxu1 %v2007_v13  ;;  %v2226_v50 = vpop.eup %2225 }
 0x251   : > { %2010 = vmatprep.subr.bf16.mxu1 %v2001_v3  ;;  %v2228_v63 = vpop.eup %2227 }
 0x252   : > { %v2230_v58 = vpop.eup %2229 }
 0x253   : > { %1913 = vmatmul.mubr.msk.f32.vlgmr.msra.gmra.mrb[0].mxu1 %vm639_vm1, %v781_v19  ;;  %v2232_v33 = vpop.eup %2231 }
 0x254   : > { %2012 = vmatpush1.bf16.msra.mxu1 %v2003_v1  ;;  %867 = vmatprep.mubr.f32.mxu1 %v2399_v9  ;;  %v2234_v37 = vpop.eup %2233 }
 0x255   : > { %2014 = vmatprep.subr.bf16.mxu1 %v2005_v18 }
 0x257   : > { %1914 = vmatmul.mubr.msk.f32.gmra.mrb[2].mxu1 %vm639_vm1, %v782_v20 }
 0x258   : > { %2016 = vmatpush1.bf16.msra.mxu1 %v2007_v13  ;;  %873 = vmatprep.mubr.f32.mxu1 %v2399_v9 }
 0x25b   : > { %1915 = vmatmul.mubr.msk.f32.gmra.mrb[4].mxu1 %vm639_vm1, %v783_v21 }
 0x25c   : > { %879 = vmatprep.mubr.f32.mxu1 %v2399_v9 }
 0x25f   : > { %1916 = vmatmul.mubr.msk.f32.gmra.mrb[6].mxu1 %vm639_vm1, %v784_v23 }
 0x260   : > { %968 = vmatprep.mubr.f32.mxu1 %v2399_v9 }
 0x263   : > { %1917 = vmatmul.mubr.msk.f32.vlgmr.msra.gmra.mrb[8].mxu1 %vm639_vm1, %v896_v25 }
 0x264   : > { %974 = vmatprep.mubr.f32.mxu1 %v2399_v9 }
 0x267   : > { %1918 = vmatmul.mubr.msk.f32.gmra.mrb[10].mxu1 %vm639_vm1, %v897_v26  ;;  %v1922_v26 = vld [vmem:[%s3139_s1 + $0x48] sm:$0xff] }
 0x268   : > { %1051 = vmatprep.mubr.f32.mxu1 %v2399_v9 }
 0x326   : > { %v863_v36 = vpop.f32.mrb[0].mxu1 }
 0x327   : > { %v886_v43 = vmul.f32 %v2220_v32, %v863_v36  ;;  %v865_v41 = vpop.f32.mrb[1].mxu1 }
 0x328   : > { %v887_v45 = vmul.f32 %v2222_v38, %v865_v41  ;;  %v1931_v41 = vld [vmem:[%s3140_s2 + $0x90] sm:$0xff] }
 0x32a   : > { %v869_v48 = vpop.f32.mrb[2].mxu1 }
 0x32b   : > { %v888_v54 = vmul.f32 %v2224_v46, %v869_v48  ;;  %v871_v60 = vpop.f32.mrb[3].mxu1  ;;  %v1932_v46 = vld [vmem:[%s3140_s2 + $0x98] sm:$0xff] }
 0x32c   : > { %v889_v55 = vmul.f32 %v2226_v50, %v871_v60 }
 0x32d   : > { %v2019_v62 = vpack.c.bf16 %v888_v54, %v886_v43 }
 0x32e   : > { %v2017_v2 = vpack.c.bf16 %v889_v55, %v887_v45  ;;  %v875_v7 = vpop.f32.mrb[4].mxu1 }
 0x32f   : > { %v890_v12 = vmul.f32 %v2228_v63, %v875_v7  ;;  %v877_v14 = vpop.f32.mrb[5].mxu1 }
 0x330   : > { %v891_v15 = vmul.f32 %v2230_v58, %v877_v14  ;;  %2018 = vmatprep.subr.bf16.mxu1 %v2017_v2  ;;  %v1933_v2 = vld [vmem:[%s3140_s2 + $0xa0] sm:$0xff] }
 0x331   : > { %2020 = vmatpush1.bf16.msra.mxu1 %v2019_v62 }
 0x332   : > { %v881_v35 = vpop.f32.mrb[6].mxu1 }
 0x333   : > { %v892_v39 = vmul.f32 %v2232_v33, %v881_v35  ;;  %v883_v40 = vpop.f32.mrb[7].mxu1 }
 0x334   : > { %v893_v42 = vmul.f32 %v2234_v37, %v883_v40 }
 0x335   : > { %v2023_v44 = vpack.c.bf16 %v892_v39, %v890_v12  ;;  %v1934_v12 = vld [vmem:[%s3140_s2 + $0xa8] sm:$0xff] }
 0x336   : > { %v2021_v47 = vpack.c.bf16 %v893_v42, %v891_v15 }
 0x338   : > { %2022 = vmatprep.subr.bf16.mxu1 %v2021_v47 }
 0x339   : > { %2024 = vmatpush1.bf16.msra.mxu1 %v2023_v44  ;;  %v1935_v44 = vld [vmem:[%s3140_s2 + $0xb0] sm:$0xff] }
 0x33c   : > { %1919 = vmatmul.mubr.msk.f32.vlgmr.msra.gmra.mrb[8].mxu1 %vm639_vm1, %v894_v49 }
 0x33d   : > { %1057 = vmatprep.mubr.f32.mxu1 %v2399_v9 }
 0x340   : > { %1920 = vmatmul.mubr.msk.f32.gmra.mrb[10].mxu1 %vm639_vm1, %v895_v51  ;;  %v1936_v51 = vld [vmem:[%s3140_s2 + $0xb8] sm:$0xff] }
 0x341   : > { %1196 = vmatprep.mubr.f32.mxu1 %v2399_v9 }
 0x40f   : > { %v1053_v61 = vpop.f32.mrb[8].mxu1 }
 0x410   : > { %v1068_v0 = vadd.f32 %v1064_v53, %v1053_v61  ;;  %v1055_v1 = vpop.f32.mrb[9].mxu1 }
 0x411   : > { %v1069_v3 = vadd.f32 %v1065_v57, %v1055_v1 }
 0x412   : > { %v2811_v13 = vadd.f32 %v1074_v56, %v1068_v0 }
 0x413   : > { %v2817_v17 = vadd.f32 %v1075_v59, %v1069_v3  ;;  %v1059_v4 = vpop.f32.mrb[10].mxu1 }
 0x414   : > { %v1070_v18 = vadd.f32 %v1066_v10, %v1059_v4  ;;  %v1061_v19 = vpop.f32.mrb[11].mxu1 }
 0x415   : > { %v1071_v20 = vadd.f32 %v1067_v6, %v1061_v19 }
 0x416   : > { %v2819_v21 = vadd.f32 %v1076_v11, %v1070_v18 }
 0x417   : > { %v2821_v23 = vadd.f32 %v1077_v16, %v1071_v20 }
 0x418   : > { %v2027_v8 = vpack.c.bf16 %v2819_v21, %v2811_v13 }
 0x419   : > { %v2025_v25 = vpack.c.bf16 %v2821_v23, %v2817_v17 }
 0x41b   : > { %2026 = vmatprep.subr.bf16.mxu1 %v2025_v25 }
 0x41c   : > { %2028 = vmatpush1.bf16.msra.mxu1 %v2027_v8 }
 0x41f   : > { %1945 = vmatmul.mubr.msk.f32.vlgmr.msra.gmra.mrb[12].mxu1 %vm401_vm0, %v1921_v5 }
 0x420   : > { %1202 = vmatprep.mubr.f32.mxu1 %v2399_v9 }
 0x423   : > { %1946 = vmatmul.mubr.msk.f32.gmra.mrb[14].mxu1 %vm401_vm0, %v1922_v26 }
 0x424   : > { %1208 = vmatprep.mubr.f32.mxu1 %v2399_v9 }
 0x427   : > { %1947 = vmatmul.mubr.msk.f32.gmra.mrb[16].mxu1 %vm401_vm0, %v1923_v27 }
 0x428   : > { %1214 = vmatprep.mubr.f32.mxu1 %v2399_v9 }
 0x42b   : > { %1948 = vmatmul.mubr.msk.f32.gmra.mrb[18].mxu1 %vm401_vm0, %v1924_v28 }
 0x42c   : > { %1220 = vmatprep.mubr.f32.mxu1 %v2399_v9 }
 0x42f   : > { %1949 = vmatmul.mubr.msk.f32.gmra.mrb[20].mxu1 %vm401_vm0, %v1925_v29 }
 0x430   : > { %1226 = vmatprep.mubr.f32.mxu1 %v2399_v9 }
 0x433   : > { %1950 = vmatmul.mubr.msk.f32.gmra.mrb[22].mxu1 %vm401_vm0, %v1926_v30 }
 0x434   : > { %1232 = vmatprep.mubr.f32.mxu1 %v2399_v9 }
 0x437   : > { %1951 = vmatmul.mubr.msk.f32.gmra.mrb[24].mxu1 %vm401_vm0, %v1927_v22 }
 0x438   : > { %1238 = vmatprep.mubr.f32.mxu1 %v2399_v9 }
 0x43b   : > { %1952 = vmatmul.mubr.msk.f32.gmra.mrb[26].mxu1 %vm401_vm0, %v1928_v24 }
 0x43c   : > { %1422 = vmatprep.mubr.f32.mxu1 %v2399_v9 }
 0x4f2   : > { %v1198_v32 = vpop.f32.mrb[12].mxu1 }
 0x4f3   : > { %v2873_v36 = vadd.f32 %v1929_v31, %v1198_v32  ;;  %v1200_v38 = vpop.f32.mrb[13].mxu1 }
 0x4f4   : > { %v2875_v43 = vadd.f32 %v1930_v34, %v1200_v38 }
 0x4f5   : > { %v1245_v45 = vand.u32 2147483647, %v2873_v36 }
 0x4f6   : > { %v1246_v48 = vand.u32 2147483647, %v2875_v43  ;;  %v1204_v50 = vpop.f32.mrb[14].mxu1 }
 0x4f7   : > { %v1253_v54 = vsub.f32 0.0, %v1245_v45  ;;  %v2885_v60 = vadd.f32 %v1931_v41, %v1204_v50  ;;  %v1206_v55 = vpop.f32.mrb[15].mxu1  ;;  %v1277_v45 = vmax.f32 %v2873_v36, 0.0  ;;  %v1278_v50 = vmax.f32 %v2875_v43, 0.0 }
 0x4f8   : > { %v1254_v62 = vsub.f32 0.0, %v1246_v48  ;;  %v2887_v63 = vadd.f32 %v1932_v46, %v1206_v55 }
 0x4f9   : > { %v1261_v7 = vmul.f32 1.442695, %v1253_v54  ;;  %v1247_v58 = vand.u32 2147483647, %v2885_v60 }
 0x4fa   : > { %v1263_v14 = vmul.f32 1.442695, %v1254_v62  ;;  %v1248_v15 = vand.u32 2147483647, %v2887_v63  ;;  %v1210_v33 = vpop.f32.mrb[16].mxu1 }
 0x4fb   : > { %2235 = vpow2.f32 %v1261_v7  ;;  %v1255_v35 = vsub.f32 0.0, %v1247_v58  ;;  %v2897_v37 = vadd.f32 %v1933_v2, %v1210_v33  ;;  %v1212_v39 = vpop.f32.mrb[17].mxu1 }
 0x4fc   : > { %2237 = vpow2.f32 %v1263_v14  ;;  %v1256_v40 = vsub.f32 0.0, %v1248_v15  ;;  %v2899_v42 = vadd.f32 %v1934_v12, %v1212_v39  ;;  %v1279_v14 = vmax.f32 %v2885_v60, 0.0 }
 0x4fd   : > { %v1265_v47 = vmul.f32 1.442695, %v1255_v35  ;;  %v1249_v49 = vand.u32 2147483647, %v2897_v37  ;;  %v1280_v35 = vmax.f32 %v2887_v63, 0.0 }
 0x4fe   : > { %v1267_v52 = vmul.f32 1.442695, %v1256_v40  ;;  %v1250_v53 = vand.u32 2147483647, %v2899_v42  ;;  %v1216_v56 = vpop.f32.mrb[18].mxu1 }
 0x4ff   : > { %2239 = vpow2.f32 %v1265_v47  ;;  %v1257_v57 = vsub.f32 0.0, %v1249_v49  ;;  %v2909_v59 = vadd.f32 %v1935_v44, %v1216_v56  ;;  %v1218_v61 = vpop.f32.mrb[19].mxu1 }
 0x500   : > { %2241 = vpow2.f32 %v1267_v52  ;;  %v1258_v0 = vsub.f32 0.0, %v1250_v53  ;;  %v2911_v1 = vadd.f32 %v1936_v51, %v1218_v61  ;;  %v1281_v52 = vmax.f32 %v2897_v37, 0.0 }
 0x501   : > { %v1269_v3 = vmul.f32 1.442695, %v1257_v57  ;;  %v1251_v10 = vand.u32 2147483647, %v2909_v59  ;;  %v1282_v61 = vmax.f32 %v2899_v42, 0.0 }
 0x502   : > { %v1271_v11 = vmul.f32 1.442695, %v1258_v0  ;;  %v1252_v6 = vand.u32 2147483647, %v2911_v1 }
 0x503   : > { %2243 = vpow2.f32 %v1269_v3  ;;  %v1259_v16 = vsub.f32 0.0, %v1251_v10 }
 0x504   : > { %2245 = vpow2.f32 %v1271_v11  ;;  %v1260_v4 = vsub.f32 0.0, %v1252_v6 }
 0x505   : > { %v2236_v18 = vpop.eup %2235  ;;  %v1273_v19 = vmul.f32 1.442695, %v1259_v16 }
 0x506   : > { %v2238_v20 = vpop.eup %2237  ;;  %v1285_v8 = vadd.f32 1.0, %v2236_v18  ;;  %v1275_v25 = vmul.f32 1.442695, %v1260_v4  ;;  %v1283_v4 = vmax.f32 %v2909_v59, 0.0 }
 0x507   : > { %v1286_v5 = vadd.f32 1.0, %v2238_v20  ;;  %2247 = vpow2.f32 %v1273_v19 }
 0x508   : > { %2249 = vlog2.f32 %v1285_v8 }
 0x509   : > { %v2240_v26 = vpop.eup %2239  ;;  %2251 = vlog2.f32 %v1286_v5 }
 0x50a   : > { %v2242_v27 = vpop.eup %2241  ;;  %v1287_v28 = vadd.f32 1.0, %v2240_v26  ;;  %2253 = vpow2.f32 %v1275_v25  ;;  %v1284_v25 = vmax.f32 %v2911_v1, 0.0 }
 0x50b   : > { %v1288_v29 = vadd.f32 1.0, %v2242_v27 }
 0x50c   : > { %2255 = vlog2.f32 %v1287_v28 }
 0x50d   : > { %v2244_v30 = vpop.eup %2243  ;;  %2257 = vlog2.f32 %v1288_v29 }
 0x50e   : > { %v2246_v22 = vpop.eup %2245  ;;  %v1289_v24 = vadd.f32 1.0, %v2244_v30 }
 0x50f   : > { %v1290_v31 = vadd.f32 1.0, %v2246_v22  ;;  %v1953_v22 = vld [vmem:[%s3141_s3 + $0x20] sm:$0xff] }
 0x510   : > { %2259 = vlog2.f32 %v1289_v24  ;;  %v1954_v24 = vld [vmem:[%s3141_s3 + $0x28] sm:$0xff] }
 0x511   : > { %v2248_v34 = vpop.eup %2247  ;;  %2261 = vlog2.f32 %v1290_v31  ;;  %v1955_v31 = vld [vmem:[%s3141_s3 + $0x30] sm:$0xff] }
 0x512   : > { %v2250_v32 = vpop.eup %2249  ;;  %v1291_v38 = vadd.f32 1.0, %v2248_v34  ;;  %v1956_v34 = vld [vmem:[%s3141_s3 + $0x38] sm:$0xff] }
 0x513   : > { %v2252_v41 = vpop.eup %2251  ;;  %v1294_v46 = vmul.f32 0.6931472, %v2250_v32  ;;  %v1937_v32 = vld [vmem:[%s3140_s2 + $0xc0] sm:$0xff] }
 0x514   : > { %v2254_v48 = vpop.eup %2253  ;;  %v1296_v54 = vmul.f32 0.6931472, %v2252_v41  ;;  %2263 = vlog2.f32 %v1291_v38  ;;  %v1938_v38 = vld [vmem:[%s3140_s2 + $0xc8] sm:$0xff] }
 0x515   : > { %v2917_v55 = vadd.f32 %v1294_v46, %v1277_v45  ;;  %v1292_v62 = vadd.f32 1.0, %v2254_v48 }
 0x516   : > { %v2256_v2 = vpop.eup %2255  ;;  %v2919_v7 = vadd.f32 %v1296_v54, %v1278_v50  ;;  %v1939_v50 = vld [vmem:[%s3140_s2 + $0xd0] sm:$0xff] }
 0x517   : > { %v2258_v58 = vpop.eup %2257  ;;  %v1317_v12 = vsub.f32 %v2873_v36, %v2917_v55  ;;  %v1298_v15 = vmul.f32 0.6931472, %v2256_v2  ;;  %2265 = vlog2.f32 %v1292_v62  ;;  %v1940_v62 = vld [vmem:[%s3140_s2 + $0xd8] sm:$0xff] }
 0x518   : > { %v1318_v33 = vsub.f32 %v2875_v43, %v2919_v7  ;;  %v1300_v39 = vmul.f32 0.6931472, %v2258_v58 }
 0x519   : > { %v2927_v40 = vadd.f32 %v1298_v15, %v1279_v14 }
 0x51a   : > { %v2260_v44 = vpop.eup %2259  ;;  %v2929_v47 = vadd.f32 %v1300_v39, %v1280_v35 }
 0x51b   : > { %v2262_v49 = vpop.eup %2261  ;;  %v1319_v51 = vsub.f32 %v2885_v60, %v2927_v40  ;;  %v1302_v53 = vmul.f32 0.6931472, %v2260_v44  ;;  %v2031_v56 = vpack.c.bf16 %v2927_v40, %v2917_v55 }
 0x51c   : > { %v1320_v57 = vsub.f32 %v2887_v63, %v2929_v47  ;;  %v1304_v0 = vmul.f32 0.6931472, %v2262_v49  ;;  %v2029_v3 = vpack.c.bf16 %v2929_v47, %v2919_v7  ;;  %v1941_v49 = vld [vmem:[%s3140_s2 + $0xe0] sm:$0xff] }
 0x51d   : > { %v2941_v10 = vadd.f32 %v1302_v53, %v1281_v52  ;;  %v1942_v53 = vld [vmem:[%s3140_s2 + $0xe8] sm:$0xff] }
 0x51e   : > { %v2264_v11 = vpop.eup %2263  ;;  %v2943_v6 = vadd.f32 %v1304_v0, %v1282_v61  ;;  %2030 = vmatprep.subr.bf16.mxu1 %v2029_v3 }
 0x51f   : > { %v1321_v16 = vsub.f32 %v2897_v37, %v2941_v10  ;;  %v1306_v18 = vmul.f32 0.6931472, %v2264_v11  ;;  %2032 = vmatpush1.bf16.msra.mxu1 %v2031_v56 }
 0x520   : > { %v1322_v19 = vsub.f32 %v2899_v42, %v2943_v6 }
 0x521   : > { %v2266_v20 = vpop.eup %2265  ;;  %v2950_v8 = vadd.f32 %v1306_v18, %v1283_v4  ;;  %v1333_v36 = vmul.f32 1.442695, %v1321_v16 }
 0x522   : > { %v1308_v5 = vmul.f32 0.6931472, %v2266_v20  ;;  %v1943_v20 = vld [vmem:[%s3140_s2 + $0xf0] sm:$0xff]  ;;  %v1335_v43 = vmul.f32 1.442695, %v1322_v19 }
 0x523   : > { %v1323_v26 = vsub.f32 %v2909_v59, %v2950_v8  ;;  %v2035_v27 = vpack.c.bf16 %v2950_v8, %v2941_v10 }
 0x524   : > { %v2957_v28 = vadd.f32 %v1308_v5, %v1284_v25  ;;  %v1944_v5 = vld [vmem:[%s3140_s2 + $0xf8] sm:$0xff] }
 0x525   : > { %v1337_v60 = vmul.f32 1.442695, %v1323_v26 }
 0x526   : > { %v1324_v29 = vsub.f32 %v2911_v1, %v2957_v28  ;;  %v2033_v30 = vpack.c.bf16 %v2957_v28, %v2943_v6 }
 0x528   : > { %2034 = vmatprep.subr.bf16.mxu1 %v2033_v30  ;;  %v1339_v63 = vmul.f32 1.442695, %v1324_v29 }
 0x529   : > { %2036 = vmatpush1.bf16.msra.mxu1 %v2035_v27 }
 0x52c   : > { %1957 = vmatmul.mubr.msk.f32.vlgmr.msra.gmra.mrb[20].mxu1 %vm639_vm1, %v1953_v22 }
 0x52d   : > { %1428 = vmatprep.mubr.f32.mxu1 %v2399_v9 }
 0x530   : > { %1958 = vmatmul.mubr.msk.f32.gmra.mrb[22].mxu1 %vm639_vm1, %v1954_v24 }
 0x531   : > { %1434 = vmatprep.mubr.f32.mxu1 %v2399_v9 }
 0x534   : > { %1959 = vmatmul.mubr.msk.f32.gmra.mrb[24].mxu1 %vm639_vm1, %v1955_v31 }
 0x535   : > { %1440 = vmatprep.mubr.f32.mxu1 %v2399_v9 }
 0x538   : > { %1960 = vmatmul.mubr.msk.f32.gmra.mrb[26].mxu1 %vm639_vm1, %v1956_v34 }
 0x5ff   : > { %v1424_v41 = vpop.f32.mrb[20].mxu1 }
 0x600   : > { %v2069_v45 = vadd.f32 %v1937_v32, %v1424_v41  ;;  %v1426_v46 = vpop.f32.mrb[21].mxu1 }
 0x601   : > { %v2070_v48 = vadd.f32 %v1938_v38, %v1426_v46 }
 0x602   : > { %v1447_v54 = vsub.f32 0.0, %v2069_v45 }
 0x603   : > { %v1448_v2 = vsub.f32 0.0, %v2070_v48  ;;  %v1430_v58 = vpop.f32.mrb[22].mxu1 }
 0x604   : > { %v1455_v14 = vmul.f32 1.442695, %v1447_v54  ;;  %v2071_v15 = vadd.f32 %v1939_v50, %v1430_v58  ;;  %v1432_v35 = vpop.f32.mrb[23].mxu1 }
 0x605   : > { %v1457_v39 = vmul.f32 1.442695, %v1448_v2  ;;  %v2072_v44 = vadd.f32 %v1940_v62, %v1432_v35 }
 0x606   : > { %2267 = vpow2.f32 %v1455_v14  ;;  %v1449_v52 = vsub.f32 0.0, %v2071_v15 }
 0x607   : > { %2269 = vpow2.f32 %v1457_v39  ;;  %v1450_v56 = vsub.f32 0.0, %v2072_v44  ;;  %v1436_v61 = vpop.f32.mrb[24].mxu1 }
 0x608   : > { %v1459_v0 = vmul.f32 1.442695, %v1449_v52  ;;  %v2073_v3 = vadd.f32 %v1941_v49, %v1436_v61  ;;  %v1438_v11 = vpop.f32.mrb[25].mxu1 }
 0x609   : > { %v1461_v4 = vmul.f32 1.442695, %v1450_v56  ;;  %v2074_v18 = vadd.f32 %v1942_v53, %v1438_v11 }
 0x60a   : > { %2271 = vpow2.f32 %v1459_v0  ;;  %v1451_v25 = vsub.f32 0.0, %v2073_v3 }
 0x60b   : > { %2273 = vpow2.f32 %v1461_v4  ;;  %v1452_v27 = vsub.f32 0.0, %v2074_v18  ;;  %v1442_v30 = vpop.f32.mrb[26].mxu1 }
 0x60c   : > { %v1463_v22 = vmul.f32 1.442695, %v1451_v25  ;;  %v2075_v24 = vadd.f32 %v1943_v20, %v1442_v30  ;;  %v1444_v31 = vpop.f32.mrb[27].mxu1 }
 0x60d   : > { %v1465_v34 = vmul.f32 1.442695, %v1452_v27  ;;  %v2076_v32 = vadd.f32 %v1944_v5, %v1444_v31  ;;  %v1961_v31 = vld [vmem:[%s3142_s4 + $0x20] sm:$0xff] }
 0x60e   : > { %2275 = vpow2.f32 %v1463_v22  ;;  %v1453_v38 = vsub.f32 0.0, %v2075_v24 }
 0x60f   : > { %v1454_v41 = vsub.f32 0.0, %v2076_v32  ;;  %2277 = vpow2.f32 %v1465_v34  ;;  %v1962_v34 = vld [vmem:[%s3142_s4 + $0x28] sm:$0xff]  ;;  %v1963_v32 = vld [vmem:[%s3142_s4 + $0x30] sm:$0xff] }
 0x610   : > { %v2268_v45 = vpop.eup %2267  ;;  %v1467_v46 = vmul.f32 1.442695, %v1453_v38  ;;  %v1964_v38 = vld [vmem:[%s3142_s4 + $0x38] sm:$0xff] }
 0x611   : > { %v2270_v48 = vpop.eup %2269  ;;  %v1471_v50 = vadd.f32 1.0, %v2268_v45  ;;  %v1469_v54 = vmul.f32 1.442695, %v1454_v41  ;;  %v1971_v41 = vld [vmem:[%s3144_s6 + $0x10] sm:$0xff]  ;;  %v1972_v45 = vld [vmem:[%s3144_s6 + $0x18] sm:$0xff] }
 0x612   : > { %v1472_v62 = vadd.f32 1.0, %v2270_v48  ;;  %2279 = vpow2.f32 %v1467_v46  ;;  %v1325_v46 = vmul.f32 1.442695, %v1317_v12  ;;  %v1327_v48 = vmul.f32 1.442695, %v1318_v33 }
 0x613   : > { %2281 = vrcp.f32 %v1471_v50  ;;  %v1329_v50 = vmul.f32 1.442695, %v1319_v51 }
 0x614   : > { %v2272_v2 = vpop.eup %2271  ;;  %2283 = vpow2.f32 %v1469_v54  ;;  %v1331_v54 = vmul.f32 1.442695, %v1320_v57 }
 0x615   : > { %v2274_v58 = vpop.eup %2273  ;;  %v1473_v14 = vadd.f32 1.0, %v2272_v2  ;;  %2285 = vrcp.f32 %v1472_v62 }
 0x616   : > { %v1474_v15 = vadd.f32 1.0, %v2274_v58 }
 0x617   : > { %2287 = vrcp.f32 %v1473_v14 }
 0x618   : > { %v2276_v35 = vpop.eup %2275  ;;  %2289 = vrcp.f32 %v1474_v15 }
 0x619   : > { %v2278_v39 = vpop.eup %2277  ;;  %v1475_v44 = vadd.f32 1.0, %v2276_v35 }
 0x61a   : > { %v1476_v52 = vadd.f32 1.0, %v2278_v39 }
 0x61b   : > { %2291 = vrcp.f32 %v1475_v44 }
 0x61c   : > { %v2280_v49 = vpop.eup %2279 }
 0x61d   : > { %v1477_v53 = vadd.f32 1.0, %v2280_v49  ;;  %v2282_v56 = vpop.eup %2281  ;;  %v1969_v49 = vld [vmem:[%s3143_s5 + $0x10] sm:$0xff] }
 0x61e   : > { %v2284_v61 = vpop.eup %2283 }
 0x61f   : > { %2293 = vrcp.f32 %v1477_v53  ;;  %v2286_v0 = vpop.eup %2285  ;;  %v1478_v3 = vadd.f32 1.0, %v2284_v61  ;;  %v1977_v53 = vld [vmem:[%s3145_s7 + $0x20] sm:$0xff]  ;;  %v1978_v61 = vld [vmem:[%s3145_s7 + $0x28] sm:$0xff] }
 0x620   : > { %2295 = vrcp.f32 %v1476_v52  ;;  %v1970_v52 = vld [vmem:[%s3143_s5 + $0x18] sm:$0xff] }
 0x621   : > { %v2288_v11 = vpop.eup %2287  ;;  %2297 = vrcp.f32 %v1478_v3 }
 0x622   : > { %v2290_v4 = vpop.eup %2289  ;;  %v2039_v18 = vpack.c.bf16 %v2288_v11, %v2282_v56  ;;  %2299 = vpow2.f32 %v1325_v46  ;;  %v1783_v56 = vstv %s1981_s29 }
 0x623   : > { %v2037_v20 = vpack.c.bf16 %v2290_v4, %v2286_v0  ;;  %2301 = vpow2.f32 %v1327_v48 }
 0x624   : > { %2303 = vpow2.f32 %v1329_v50 }
 0x625   : > { %2038 = vmatprep.subr.bf16.mxu0 %v2037_v20  ;;  %v2292_v25 = vpop.eup %2291  ;;  %2305 = vpow2.f32 %v1331_v54 }
 0x626   : > { %2040 = vmatpush1.bf16.msra.mxu0 %v2039_v18  ;;  %2307 = vpow2.f32 %v1333_v36 }
 0x627   : > { %2309 = vpow2.f32 %v1335_v43 }
 0x628   : > { %2311 = vpow2.f32 %v1337_v60 }
 0x629   : > { %v2294_v5 = vpop.eup %2293  ;;  %2313 = vpow2.f32 %v1339_v63 }
 0x62a   : > { %v2043_v27 = vpack.c.bf16 %v2294_v5, %v2292_v25  ;;  %v2296_v30 = vpop.eup %2295  ;;  %v1980_v5 = vld [vmem:[%s3145_s7 + $0x38] sm:$0xff] }
 0x62b   : > { %v2298_v22 = vpop.eup %2297 }
 0x62c   : > { %v2041_v24 = vpack.c.bf16 %v2298_v22, %v2296_v30  ;;  %v2300_v55 = vpop.eup %2299 }
 0x62d   : > { %v2302_v12 = vpop.eup %2301 }
 0x62e   : > { %2042 = vmatprep.subr.bf16.mxu0 %v2041_v24  ;;  %v2304_v42 = vpop.eup %2303 }
 0x62f   : > { %2044 = vmatpush1.bf16.msra.mxu0 %v2043_v27  ;;  %v2306_v51 = vpop.eup %2305 }
 0x630   : > { %2046 = vmatprep.subr.bf16.mxu0 %v2037_v20  ;;  %v2308_v16 = vpop.eup %2307  ;;  %v1979_v20 = vld [vmem:[%s3145_s7 + $0x30] sm:$0xff] }
 0x631   : > { %v2310_v1 = vpop.eup %2309 }
 0x632   : > { %1965 = vmatmul.mubr.msk.f32.vlgmr.msra.gmra.mrb[16].mxu0 %vm639_vm1, %v1961_v31  ;;  %v2312_v62 = vpop.eup %2311  ;;  %v1787_v31 = vmul.f32 %v1783_v56, %v2821_v23 }
 0x633   : > { %2048 = vmatpush1.bf16.msra.mxu0 %v2039_v18  ;;  %1574 = vmatprep.mubr.f32.mxu0 %v2399_v9  ;;  %v2314_v58 = vpop.eup %2313  ;;  %v1785_v18 = vmul.f32 %v1783_v56, %v2817_v17  ;;  %v1786_v17 = vmul.f32 %v1783_v56, %v2819_v21 }
 0x634   : > { %2050 = vmatprep.subr.bf16.mxu0 %v2041_v24 }
 0x636   : > { %1966 = vmatmul.mubr.msk.f32.gmra.mrb[18].mxu0 %vm639_vm1, %v1962_v34 }
 0x637   : > { %2052 = vmatpush1.bf16.msra.mxu0 %v2043_v27  ;;  %1580 = vmatprep.mubr.f32.mxu0 %v2399_v9 }
 0x63a   : > { %1967 = vmatmul.mubr.msk.f32.gmra.mrb[20].mxu0 %vm639_vm1, %v1963_v32 }
 0x63b   : > { %1586 = vmatprep.mubr.f32.mxu0 %v2399_v9 }
 0x63e   : > { %1968 = vmatmul.mubr.msk.f32.gmra.mrb[22].mxu0 %vm639_vm1, %v1964_v38 }
 0x63f   : > { %1677 = vmatprep.mubr.f32.mxu0 %v2399_v9 }
 0x642   : > { %1973 = vmatmul.mubr.msk.f32.vlgmr.msra.gmra.mrb[24].mxu0 %vm639_vm1, %v1971_v41 }
 0x643   : > { %1683 = vmatprep.mubr.f32.mxu0 %v2399_v9 }
 0x646   : > { %1974 = vmatmul.mubr.msk.f32.gmra.mrb[26].mxu0 %vm639_vm1, %v1972_v45 }
 0x647   : > { %1760 = vmatprep.mubr.f32.mxu0 %v2399_v9 }
 0x705   : > { %v1570_v7 = vpop.f32.mrb[16].mxu0 }
 0x706   : > { %v1593_v37 = vmul.f32 %v2300_v55, %v1570_v7  ;;  %v1572_v33 = vpop.f32.mrb[17].mxu0 }
 0x707   : > { %v1594_v40 = vmul.f32 %v2302_v12, %v1572_v33 }
 0x709   : > { %v1576_v47 = vpop.f32.mrb[18].mxu0 }
 0x70a   : > { %v1595_v57 = vmul.f32 %v2304_v42, %v1576_v47  ;;  %v1578_v10 = vpop.f32.mrb[19].mxu0 }
 0x70b   : > { %v1596_v59 = vmul.f32 %v2306_v51, %v1578_v10 }
 0x70c   : > { %v2055_v6 = vpack.c.bf16 %v1595_v57, %v1593_v37 }
 0x70d   : > { %v2053_v19 = vpack.c.bf16 %v1596_v59, %v1594_v40  ;;  %v1582_v8 = vpop.f32.mrb[20].mxu0 }
 0x70e   : > { %v1597_v26 = vmul.f32 %v2308_v16, %v1582_v8  ;;  %v1584_v28 = vpop.f32.mrb[21].mxu0 }
 0x70f   : > { %v1598_v29 = vmul.f32 %v2310_v1, %v1584_v28  ;;  %2054 = vmatprep.subr.bf16.mxu0 %v2053_v19 }
 0x710   : > { %2056 = vmatpush1.bf16.msra.mxu0 %v2055_v6 }
 0x711   : > { %v1588_v2 = vpop.f32.mrb[22].mxu0 }
 0x712   : > { %v1599_v14 = vmul.f32 %v2312_v62, %v1588_v2  ;;  %v1590_v15 = vpop.f32.mrb[23].mxu0 }
 0x713   : > { %v1600_v35 = vmul.f32 %v2314_v58, %v1590_v15 }
 0x714   : > { %v2059_v39 = vpack.c.bf16 %v1599_v14, %v1597_v26 }
 0x715   : > { %v2057_v44 = vpack.c.bf16 %v1600_v35, %v1598_v29 }
 0x717   : > { %2058 = vmatprep.subr.bf16.mxu0 %v2057_v44 }
 0x718   : > { %2060 = vmatpush1.bf16.msra.mxu0 %v2059_v39 }
 0x71b   : > { %1975 = vmatmul.mubr.msk.f32.vlgmr.msra.gmra.mrb[24].mxu0 %vm639_vm1, %v1969_v49 }
 0x71c   : > { %1766 = vmatprep.mubr.f32.mxu0 %v2399_v9  ;;  %v1784_v9 = vmul.f32 %v1783_v56, %v2811_v13 }
 0x71f   : > { %1976 = vmatmul.mubr.msk.f32.gmra.mrb[26].mxu0 %vm639_vm1, %v1970_v52 }
 0x7ee   : > { %v1762_v0 = vpop.f32.mrb[24].mxu0 }
 0x7ef   : > { %v1778_v3 = vadd.f32 %v1977_v53, %v1762_v0  ;;  %v1764_v11 = vpop.f32.mrb[25].mxu0 }
 0x7f0   : > { %v1779_v4 = vadd.f32 %v1978_v61, %v1764_v11 }
 0x7f1   : > { %v1788_v25 = vadd.f32 %v1784_v9, %v1778_v3 }
 0x7f2   : > { %v1789_v27 = vadd.f32 %v1785_v18, %v1779_v4  ;;  %v1768_v30 = vpop.f32.mrb[26].mxu0 }
 0x7f3   : > { %1792 = vst [vmem:[%s370_s22] sm:$0xff] %v1788_v25  ;;  %v1780_v13 = vadd.f32 %v1979_v20, %v1768_v30  ;;  %v1770_v22 = vpop.f32.mrb[27].mxu0 }
 0x7f4   : > { %1793 = vst [vmem:[%s370_s22 + $0x8] sm:$0xff] %v1789_v27  ;;  %v1781_v24 = vadd.f32 %v1980_v5, %v1770_v22 }
 0x7f5   : > { %v1790_v34 = vadd.f32 %v1786_v17, %v1780_v13 }
 0x7f6   : > { %v1791_v32 = vadd.f32 %v1787_v31, %v1781_v24 }
 0x7f7   : > { %1794 = vst [vmem:[%s370_s22 + $0x10] sm:$0xff] %v1790_v34 }
 0x7f8   : > { %1795 = vst [vmem:[%s370_s22 + $0x18] sm:$0xff] %v1791_v32 }
 0x7f9   : > { %2343 = shalt.err (!%p2340_p2)
}
 0x7fa   : > { %s2344_s19 = scalar_lea.hbm %s3092_s13, 512  ;;  %s2348_s14 = scalar_lea.hbm %s3147_s9, 1024 }
 0x7fb   : > { %p2345_p3 = scmp.ne.s32.totalorder %s3092_s13, %s2344_s19  ;;  %p2349_p8 = scmp.lt.u32.totalorder %s3092_s13, %s3147_s9 }
 0x7fc   : > { %p2350_p9 = scmp.lt.u32.totalorder %s2348_s14, %s2344_s19  ;;  %p2352_p11 = scmp.lt.u32.totalorder %s2344_s19, %s3092_s13 }
 0x7fd   : > { %p2346_p4 = pnand %p2345_p3, %p3153_p10 }
 0x7fe   : > { %p2351_p5 = por %p2350_p9, %p2349_p8 }
 0x7ff   : > { %p2347_p7 = pneg %p2346_p4 }
 0x800   : > { %p2353_p12 = por %p2352_p11, %p2351_p5 }
 0x802   : > { %p2354_p13 = pnand %p2353_p12, %p2347_p7 }
 0x804   : > { %2357 = shalt.err (!%p2354_p13)
}
 0x805   : > { %s2401_s23 = smov 256   ;;  %s2402_s24 = smov 512  }
 0x806   : > { %s2403_s26 = smov 16  }
 0x807   : > { %2105 = dma.vmem_to_hbm [thread:$0]  (%p3153_p10), %s3086_s27, 512, %s3092_s13, %s3096_s17, %s2401_s23, %s2402_s24, %s2403_s26  }
 0x808 PF: > { %s1825_s28 = sand.u32 1, %s2384_s30   ;;  %p3154_p0 = scmp.ne.s32.totalorder %s3151_s21, 0 }
 0x809   : > { %s1826_s19 = scalar_lea.sflag [#allocation4], %s1825_s28 }
 0x80a   : > { %p2112_p1 = pnand %p1893_p6, %p3154_p0 }
 0x80c   : > { %2379 = dma.done.wait (!%p2112_p1), %s1826_s19, 512  }
 0x80d   : > { %2381 = vsyncadd (!%p2112_p1), %s1826_s19, 4294966784  ;;  %p20_p2 = scmp.ge.s32.totalorder %s2479_s15, 4   ;;  %s3155_s30 = smov %s2388_s10 }
 0x80e   : > { %s3156_s10 = smov %s2392_s11  ;;  %s3157_s11 = smov %s2491_s18 }
 0x80f   : > { %s3158_s12 = smov %s2479_s15  ;;  %22 = sbr.rel (!%p20_p2) target bundleno = 4 (0x4), region = 131 }
 0x816   :  { %1831 = vsyncpa [#allocation4], 1 }
 0x817   :  { %1833 = vsyncpa [#allocation4 + $0x1], 1 }
 0x818   :  { %1834 = vsyncpa [#allocation5], 1 }
 0x819   :  { %1836 = vsyncpa [#allocation5 + $0x1], 1 }

</bundles_post_ra>
